<compile_context>
chip_gen: v6e
topology: v6e:2x2x1
jax: 0.10.0
libtpu: 0.0.40
codegen_flags: <defaults>
</compile_context>

<pallas_src>
import functools

import jax
import jax.numpy as jnp
import numpy as np
from jax import lax
from jax.experimental import pallas as pl
from jax.experimental.pallas import tpu as pltpu

EPS = 1e-5


def _dw3x3(xs_ref, w_ref, b_ref, taps, *, HW, PAD):
    """Depthwise 3x3 'SAME' conv on the (R, HW) layout.

    xs_ref : (R, 2*PAD + HW) halo scratch; activation lives in columns [PAD, PAD+HW).
    w_ref  : (R, 9) per-row taps, column k = (di+1)*3 + (dj+1).
    b_ref  : (R, 1) depthwise bias.
    taps   : [(k, s, mask)] for the 8 off-centre taps; mask is a (1, HW) bool, hoisted
             once by the caller and shared by both convs.
    """
    center = xs_ref[:, PAD:PAD + HW]
    acc = center * w_ref[:, 4:5] + b_ref[...]
    for k, s, mask in taps:
        # Shifted windows are vector loads straight from the scratch ref; halo columns
        # hold zeros and out-of-image positions are masked anyway.
        win = xs_ref[:, PAD + s:PAD + s + HW]
        acc = acc + jnp.where(mask, win, 0.0) * w_ref[:, k:k + 1]
    return acc


def _pw_bn(xs_ref, pwt_ref, pwb_ref, g_ref, b_ref, *, N, C, HW, PAD, inv_cnt, relu):
    """1x1 conv (VPU broadcast FMAs — no MXU at C=P=4) + training-mode BatchNorm.

    The depthwise output has been staged in xs_ref[:, PAD:PAD+HW]; the pointwise mixes
    the C rows of each batch group with (C,1)*(1,HW) broadcast multiply-adds.
    Returns a list of per-batch-group (C, HW) values.
    NOTE: at production widths (C, P >= 128) this should become a block-diagonal bf16
    MXU matmul (or 9 folded W_tap*pw matmuls); kept on the VPU because C = P = 4 here.
    """
    ys = []
    for n in range(N):
        y = None
        for c in range(C):
            row = xs_ref[n * C + c:n * C + c + 1, PAD:PAD + HW]   # (1, HW) ref row read
            term = pwt_ref[:, c:c + 1] * row                       # (C,1)*(1,HW) -> (C,HW)
            y = term if y is None else y + term
        ys.append(y + pwb_ref[...])

    # BatchNorm (training mode): per-channel stats over batch and spatial, i.e. over all
    # lanes of every batch group. Two-pass variance (better conditioned than E[x^2]-mu^2).
    s1 = ys[0].sum(axis=1, keepdims=True)
    for y in ys[1:]:
        s1 = s1 + y.sum(axis=1, keepdims=True)
    mu = s1 * inv_cnt                                   # (C, 1)
    ds = [y - mu for y in ys]
    s2 = (ds[0] * ds[0]).sum(axis=1, keepdims=True)
    for d in ds[1:]:
        s2 = s2 + (d * d).sum(axis=1, keepdims=True)
    var = s2 * inv_cnt                                  # biased, matches BN training mode
    scale = g_ref[...] * lax.rsqrt(var + EPS)
    outs = [d * scale + b_ref[...] for d in ds]
    if relu:
        outs = [jnp.maximum(o, 0.0) for o in outs]
    return outs


def dw_basic_block_kernel(x_ref,
                          dw1_ref, dwb1_ref, pw1t_ref, pwb1_ref, g1_ref, b1_ref,
                          dw2_ref, dwb2_ref, pw2t_ref, pwb2_ref, g2_ref, b2_ref,
                          out_ref, xs_ref, *, N, C, H, W):
    HW = H * W
    PAD = (xs_ref.shape[1] - HW) // 2
    inv_cnt = 1.0 / (N * HW)

    # Zero only the halo strips (one lane-aligned vreg store each); the interior is
    # always written before it is read.
    # TODO(synk): guard the halo zeroing with pl.when(program_id == 0) once this kernel
    #             grows a grid (scratch persists across grid steps).
    halo = jnp.zeros((xs_ref.shape[0], PAD), xs_ref.dtype)
    xs_ref[:, :PAD] = halo
    xs_ref[:, PAD + HW:] = halo

    # Edge-validity masks: hoisted once, shared by both convs; bitwise index math when
    # H, W are powers of two (cheaper than // and % on the VALU).
    pos = lax.broadcasted_iota(jnp.int32, (1, HW), 1)
    if W & (W - 1) == 0:
        w_idx = pos & (W - 1)
        h_idx = pos >> (W.bit_length() - 1)
    else:
        w_idx = pos % W
        h_idx = pos // W
    not_top, not_bot = h_idx > 0, h_idx < H - 1
    not_lft, not_rgt = w_idx > 0, w_idx < W - 1
    taps = []
    for di in (-1, 0, 1):
        for dj in (-1, 0, 1):
            if di == 0 and dj == 0:
                continue
            conds = ([not_top] if di < 0 else []) + ([not_bot] if di > 0 else []) \
                  + ([not_lft] if dj < 0 else []) + ([not_rgt] if dj > 0 else [])
            taps.append(((di + 1) * 3 + (dj + 1), di * W + dj,
                         functools.reduce(jnp.logical_and, conds)))

    # ---------------- conv1: depthwise 3x3 -> pointwise 1x1 -> BN -> ReLU --------------
    xs_ref[:, PAD:PAD + HW] = x_ref[...]
    acc = _dw3x3(xs_ref, dw1_ref, dwb1_ref, taps, HW=HW, PAD=PAD)
    xs_ref[:, PAD:PAD + HW] = acc          # stage dw output for the pointwise row reads
    ys = _pw_bn(xs_ref, pw1t_ref, pwb1_ref, g1_ref, b1_ref,
                N=N, C=C, HW=HW, PAD=PAD, inv_cnt=inv_cnt, relu=True)

    # ---------------- conv2: depthwise 3x3 -> pointwise 1x1 -> BN ----------------------
    for n in range(N):
        xs_ref[n * C:(n + 1) * C, PAD:PAD + HW] = ys[n]
    acc = _dw3x3(xs_ref, dw2_ref, dwb2_ref, taps, HW=HW, PAD=PAD)
    xs_ref[:, PAD:PAD + HW] = acc
    zs = _pw_bn(xs_ref, pw2t_ref, pwb2_ref, g2_ref, b2_ref,
                N=N, C=C, HW=HW, PAD=PAD, inv_cnt=inv_cnt, relu=False)

    # ---------------- residual add + final ReLU (lane-dense stores) --------------------
    for n in range(N):
        res = x_ref[n * C:(n + 1) * C, :]
        out_ref[n * C:(n + 1) * C, :] = jnp.maximum(zs[n] + res, 0.0)


def _prepare_params(p, N):
    """PyTorch-native parameter shapes -> kernel layout (rows = (batch, channel) pairs
    for the depthwise; pointwise / BN params stay per-channel)."""
    C = p["dw1_w"].shape[0]
    P = p["pw1_w"].shape[0]
    return dict(
        dw1=jnp.tile(p["dw1_w"].reshape(C, 9), (N, 1)),
        dwb1=jnp.tile(p["dw1_b"].reshape(C, 1), (N, 1)),
        pw1t=p["pw1_w"].reshape(P, C), pwb1=p["pw1_b"].reshape(P, 1),
        g1=p["bn1_g"].reshape(P, 1),   b1=p["bn1_b"].reshape(P, 1),
        dw2=jnp.tile(p["dw2_w"].reshape(P, 9), (N, 1)),
        dwb2=jnp.tile(p["dw2_b"].reshape(P, 1), (N, 1)),
        pw2t=p["pw2_w"].reshape(P, P), pwb2=p["pw2_b"].reshape(P, 1),
        g2=p["bn2_g"].reshape(P, 1),   b2=p["bn2_b"].reshape(P, 1),
    )


def dw_basic_block(x_nchw, params):
    """x_nchw: (N, C, H, W) float32 -> (N, P, H, W) float32."""
    N, C, H, W = x_nchw.shape
    P = params["pw1_w"].shape[0]
    assert C == P, "downsample=None residual path requires inplanes == planes"
    HW = H * W
    R = N * C
    PAD = pl.cdiv(W + 1, 128) * 128     # halo >= W+1 columns, lane-aligned interior

    kp = _prepare_params(params, N)
    # Pure row-major reshape of NCHW (no transpose, no HBM round trip).
    x2d = x_nchw.reshape(R, HW)

    # TODO(synk): bf16 activations/weights with f32 accumulators would halve HBM/VMEM
    #             traffic on v6e/v7x; kept f32 for exact parity with the f32 reference
    #             (and v5e's f32-only VPU).
    vmem = pl.BlockSpec(memory_space=pltpu.MemorySpace.VMEM)
    args = (x2d,
            kp["dw1"], kp["dwb1"], kp["pw1t"], kp["pwb1"], kp["g1"], kp["b1"],
            kp["dw2"], kp["dwb2"], kp["pw2t"], kp["pwb2"], kp["g2"], kp["b2"])

    out2d = pl.pallas_call(
        functools.partial(dw_basic_block_kernel, N=N, C=C, H=H, W=W),
        out_shape=jax.ShapeDtypeStruct((R, HW), jnp.float32),
        in_specs=[vmem] * len(args),
        out_specs=vmem,
        scratch_shapes=[pltpu.VMEM((R, 2 * PAD + HW), jnp.float32)],
    )(*args)

    return out2d.reshape(N, P, H, W)


# ---------------- pure-JAX reference (NCHW, for correctness check) ----------------
def _bn_train(h, g, b):
    mu = jnp.mean(h, axis=(0, 2, 3), keepdims=True)
    var = jnp.mean((h - mu) ** 2, axis=(0, 2, 3), keepdims=True)
    return (h - mu) * lax.rsqrt(var + EPS) * g.reshape(1, -1, 1, 1) + b.reshape(1, -1, 1, 1)


def ref_forward(x, p):
    dn = ("NCHW", "OIHW", "NCHW")

    def dw_pw(h, dw_w, dw_b, pw_w, pw_b, groups):
        h = lax.conv_general_dilated(h, dw_w, (1, 1), "SAME",
                                     dimension_numbers=dn, feature_group_count=groups)
        h = h + dw_b.reshape(1, -1, 1, 1)
        h = lax.conv_general_dilated(h, pw_w, (1, 1), "SAME", dimension_numbers=dn)
        return h + pw_b.reshape(1, -1, 1, 1)

    C = x.shape[1]
    P = p["pw1_w"].shape[0]
    h = dw_pw(x, p["dw1_w"], p["dw1_b"], p["pw1_w"], p["pw1_b"], C)
    h = jnp.maximum(_bn_train(h, p["bn1_g"], p["bn1_b"]), 0.0)
    h = dw_pw(h, p["dw2_w"], p["dw2_b"], p["pw2_w"], p["pw2_b"], P)
    h = _bn_train(h, p["bn2_g"], p["bn2_b"])
    return jnp.maximum(h + x, 0.0)


if __name__ == "__main__":
    N, C, H, W = 2, 4, 16, 16          # inplanes = planes = 4, stride = 1, no downsample
    P = C

    key = jax.random.PRNGKey(0)
    kx, *kp = jax.random.split(key, 13)

    # parameters in PyTorch-native shapes (as nn.Conv2d / nn.BatchNorm2d hold them)
    params = {
        "dw1_w": 0.2 * jax.random.normal(kp[0], (C, 1, 3, 3), jnp.float32),
        "dw1_b": 0.1 * jax.random.normal(kp[1], (C,), jnp.float32),
        "pw1_w": 0.2 * jax.random.normal(kp[2], (P, C, 1, 1), jnp.float32),
        "pw1_b": 0.1 * jax.random.normal(kp[3], (P,), jnp.float32),
        "bn1_g": 1.0 + 0.1 * jax.random.normal(kp[4], (P,), jnp.float32),
        "bn1_b": 0.1 * jax.random.normal(kp[5], (P,), jnp.float32),
        "dw2_w": 0.2 * jax.random.normal(kp[6], (P, 1, 3, 3), jnp.float32),
        "dw2_b": 0.1 * jax.random.normal(kp[7], (P,), jnp.float32),
        "pw2_w": 0.2 * jax.random.normal(kp[8], (P, P, 1, 1), jnp.float32),
        "pw2_b": 0.1 * jax.random.normal(kp[9], (P,), jnp.float32),
        "bn2_g": 1.0 + 0.1 * jax.random.normal(kp[10], (P,), jnp.float32),
        "bn2_b": 0.1 * jax.random.normal(kp[11], (P,), jnp.float32),
    }
    x = jax.random.normal(kx, (N, C, H, W), jnp.float32)   # NCHW, PyTorch convention

    out = jax.block_until_ready(dw_basic_block(x, params))
    ref = jax.block_until_ready(ref_forward(x, params))

    np.testing.assert_allclose(np.asarray(out), np.asarray(ref), rtol=2e-3, atol=2e-4)
    print("KERNEL_OK")
</pallas_src>

<mosaic_0001>
module attributes {stable_mosaic.version = 11 : i64} {
  func.func @dw_basic_block_kernel(%arg0: memref<8x256xf32, #tpu.memory_space<vmem>>, %arg1: memref<8x9xf32, #tpu.memory_space<vmem>>, %arg2: memref<8x1xf32, #tpu.memory_space<vmem>>, %arg3: memref<4x4xf32, #tpu.memory_space<vmem>>, %arg4: memref<4x1xf32, #tpu.memory_space<vmem>>, %arg5: memref<4x1xf32, #tpu.memory_space<vmem>>, %arg6: memref<4x1xf32, #tpu.memory_space<vmem>>, %arg7: memref<8x9xf32, #tpu.memory_space<vmem>>, %arg8: memref<8x1xf32, #tpu.memory_space<vmem>>, %arg9: memref<4x4xf32, #tpu.memory_space<vmem>>, %arg10: memref<4x1xf32, #tpu.memory_space<vmem>>, %arg11: memref<4x1xf32, #tpu.memory_space<vmem>>, %arg12: memref<4x1xf32, #tpu.memory_space<vmem>>, %arg13: memref<8x256xf32, #tpu.memory_space<vmem>>, %arg14: memref<8x512xf32, #tpu.memory_space<vmem>>) attributes {dimension_semantics = [], scalar_prefetch = 0 : i64, scratch_operands = 1 : i64, tpu.core_type = #tpu.core_type<tc>} {
    %cst = arith.constant 0.000000e+00 : f32
    %0 = vector.broadcast %cst : f32 to vector<8x128xf32>
    %c0 = arith.constant 0 : index
    %c0_0 = arith.constant 0 : index
    %1 = vector.load %arg14[%c0, %c0_0] : memref<8x512xf32, #tpu.memory_space<vmem>>, vector<8x128xf32>
    tpu.vector_store %arg14[%c0, %c0_0], %0 {strides = array<i32>} : memref<8x512xf32, #tpu.memory_space<vmem>>, vector<8x128xf32>,
    %c0_1 = arith.constant 0 : index
    %c384 = arith.constant 384 : index
    %2 = vector.load %arg14[%c0_1, %c384] : memref<8x512xf32, #tpu.memory_space<vmem>>, vector<8x128xf32>
    tpu.vector_store %arg14[%c0_1, %c384], %0 {strides = array<i32>} : memref<8x512xf32, #tpu.memory_space<vmem>>, vector<8x128xf32>,
    %3 = tpu.iota {dimensions = array<i32: 1>} : vector<1x256xi32>
    %c15_i32 = arith.constant 15 : i32
    %4 = vector.broadcast %c15_i32 : i32 to vector<1x256xi32>
    %5 = arith.andi %3, %4 : vector<1x256xi32>
    %c4_i32 = arith.constant 4 : i32
    %6 = vector.broadcast %c4_i32 : i32 to vector<1x256xi32>
    %7 = arith.shrsi %3, %6 : vector<1x256xi32>
    %c0_i32 = arith.constant 0 : i32
    %8 = vector.broadcast %c0_i32 : i32 to vector<1x256xi32>
    %9 = arith.cmpi sgt, %7, %8 : vector<1x256xi32>
    %c15_i32_2 = arith.constant 15 : i32
    %10 = vector.broadcast %c15_i32_2 : i32 to vector<1x256xi32>
    %11 = arith.cmpi slt, %7, %10 : vector<1x256xi32>
    %c0_i32_3 = arith.constant 0 : i32
    %12 = vector.broadcast %c0_i32_3 : i32 to vector<1x256xi32>
    %13 = arith.cmpi sgt, %5, %12 : vector<1x256xi32>
    %c15_i32_4 = arith.constant 15 : i32
    %14 = vector.broadcast %c15_i32_4 : i32 to vector<1x256xi32>
    %15 = arith.cmpi slt, %5, %14 : vector<1x256xi32>
    %16 = arith.andi %9, %13 : vector<1x256xi1>
    %17 = arith.andi %9, %15 : vector<1x256xi1>
    %18 = arith.andi %11, %13 : vector<1x256xi1>
    %19 = arith.andi %11, %15 : vector<1x256xi1>
    %c0_5 = arith.constant 0 : index
    %c0_6 = arith.constant 0 : index
    %20 = vector.load %arg0[%c0_5, %c0_6] : memref<8x256xf32, #tpu.memory_space<vmem>>, vector<8x256xf32>
    %c0_7 = arith.constant 0 : index
    %c128 = arith.constant 128 : index
    %21 = vector.load %arg14[%c0_7, %c128] : memref<8x512xf32, #tpu.memory_space<vmem>>, vector<8x256xf32>
    tpu.vector_store %arg14[%c0_7, %c128], %20 {strides = array<i32>} : memref<8x512xf32, #tpu.memory_space<vmem>>, vector<8x256xf32>,
    %c0_8 = arith.constant 0 : index
    %c128_9 = arith.constant 128 : index
    %22 = vector.load %arg14[%c0_8, %c128_9] : memref<8x512xf32, #tpu.memory_space<vmem>>, vector<8x256xf32>
    %c0_10 = arith.constant 0 : index
    %c4 = arith.constant 4 : index
    %23 = vector.load %arg1[%c0_10, %c4] : memref<8x9xf32, #tpu.memory_space<vmem>>, vector<8x1xf32>
    %24 = vector.broadcast %23 : vector<8x1xf32> to vector<8x256xf32>
    %25 = arith.mulf %22, %24 : vector<8x256xf32>
    %c0_11 = arith.constant 0 : index
    %c0_12 = arith.constant 0 : index
    %26 = vector.load %arg2[%c0_11, %c0_12] : memref<8x1xf32, #tpu.memory_space<vmem>>, vector<8x1xf32>
    %27 = vector.broadcast %26 : vector<8x1xf32> to vector<8x256xf32>
    %28 = arith.addf %25, %27 : vector<8x256xf32>
    %c0_13 = arith.constant 0 : index
    %c111 = arith.constant 111 : index
    %29 = vector.load %arg14[%c0_13, %c111] : memref<8x512xf32, #tpu.memory_space<vmem>>, vector<8x256xf32>
    %cst_14 = arith.constant 0.000000e+00 : f32
    %30 = vector.shape_cast %16 : vector<1x256xi1> to vector<1x256xi1>
    %31 = vector.broadcast %30 : vector<1x256xi1> to vector<8x256xi1>
    %32 = vector.broadcast %cst_14 : f32 to vector<8x256xf32>
    %33 = arith.select %31, %29, %32 : vector<8x256xi1>, vector<8x256xf32>
    %c0_15 = arith.constant 0 : index
    %c0_16 = arith.constant 0 : index
    %34 = vector.load %arg1[%c0_15, %c0_16] : memref<8x9xf32, #tpu.memory_space<vmem>>, vector<8x1xf32>
    %35 = vector.broadcast %34 : vector<8x1xf32> to vector<8x256xf32>
    %36 = arith.mulf %33, %35 : vector<8x256xf32>
    %37 = arith.addf %28, %36 : vector<8x256xf32>
    %c0_17 = arith.constant 0 : index
    %c112 = arith.constant 112 : index
    %38 = vector.load %arg14[%c0_17, %c112] : memref<8x512xf32, #tpu.memory_space<vmem>>, vector<8x256xf32>
    %cst_18 = arith.constant 0.000000e+00 : f32
    %39 = vector.shape_cast %9 : vector<1x256xi1> to vector<1x256xi1>
    %40 = vector.broadcast %39 : vector<1x256xi1> to vector<8x256xi1>
    %41 = vector.broadcast %cst_18 : f32 to vector<8x256xf32>
    %42 = arith.select %40, %38, %41 : vector<8x256xi1>, vector<8x256xf32>
    %c0_19 = arith.constant 0 : index
    %c1 = arith.constant 1 : index
    %43 = vector.load %arg1[%c0_19, %c1] : memref<8x9xf32, #tpu.memory_space<vmem>>, vector<8x1xf32>
    %44 = vector.broadcast %43 : vector<8x1xf32> to vector<8x256xf32>
    %45 = arith.mulf %42, %44 : vector<8x256xf32>
    %46 = arith.addf %37, %45 : vector<8x256xf32>
    %c0_20 = arith.constant 0 : index
    %c113 = arith.constant 113 : index
    %47 = vector.load %arg14[%c0_20, %c113] : memref<8x512xf32, #tpu.memory_space<vmem>>, vector<8x256xf32>
    %cst_21 = arith.constant 0.000000e+00 : f32
    %48 = vector.shape_cast %17 : vector<1x256xi1> to vector<1x256xi1>
    %49 = vector.broadcast %48 : vector<1x256xi1> to vector<8x256xi1>
    %50 = vector.broadcast %cst_21 : f32 to vector<8x256xf32>
    %51 = arith.select %49, %47, %50 : vector<8x256xi1>, vector<8x256xf32>
    %c0_22 = arith.constant 0 : index
    %c2 = arith.constant 2 : index
    %52 = vector.load %arg1[%c0_22, %c2] : memref<8x9xf32, #tpu.memory_space<vmem>>, vector<8x1xf32>
    %53 = vector.broadcast %52 : vector<8x1xf32> to vector<8x256xf32>
    %54 = arith.mulf %51, %53 : vector<8x256xf32>
    %55 = arith.addf %46, %54 : vector<8x256xf32>
    %c0_23 = arith.constant 0 : index
    %c127 = arith.constant 127 : index
    %56 = vector.load %arg14[%c0_23, %c127] : memref<8x512xf32, #tpu.memory_space<vmem>>, vector<8x256xf32>
    %cst_24 = arith.constant 0.000000e+00 : f32
    %57 = vector.shape_cast %13 : vector<1x256xi1> to vector<1x256xi1>
    %58 = vector.broadcast %57 : vector<1x256xi1> to vector<8x256xi1>
    %59 = vector.broadcast %cst_24 : f32 to vector<8x256xf32>
    %60 = arith.select %58, %56, %59 : vector<8x256xi1>, vector<8x256xf32>
    %c0_25 = arith.constant 0 : index
    %c3 = arith.constant 3 : index
    %61 = vector.load %arg1[%c0_25, %c3] : memref<8x9xf32, #tpu.memory_space<vmem>>, vector<8x1xf32>
    %62 = vector.broadcast %61 : vector<8x1xf32> to vector<8x256xf32>
    %63 = arith.mulf %60, %62 : vector<8x256xf32>
    %64 = arith.addf %55, %63 : vector<8x256xf32>
    %c0_26 = arith.constant 0 : index
    %c129 = arith.constant 129 : index
    %65 = vector.load %arg14[%c0_26, %c129] : memref<8x512xf32, #tpu.memory_space<vmem>>, vector<8x256xf32>
    %cst_27 = arith.constant 0.000000e+00 : f32
    %66 = vector.shape_cast %15 : vector<1x256xi1> to vector<1x256xi1>
    %67 = vector.broadcast %66 : vector<1x256xi1> to vector<8x256xi1>
    %68 = vector.broadcast %cst_27 : f32 to vector<8x256xf32>
    %69 = arith.select %67, %65, %68 : vector<8x256xi1>, vector<8x256xf32>
    %c0_28 = arith.constant 0 : index
    %c5 = arith.constant 5 : index
    %70 = vector.load %arg1[%c0_28, %c5] : memref<8x9xf32, #tpu.memory_space<vmem>>, vector<8x1xf32>
    %71 = vector.broadcast %70 : vector<8x1xf32> to vector<8x256xf32>
    %72 = arith.mulf %69, %71 : vector<8x256xf32>
    %73 = arith.addf %64, %72 : vector<8x256xf32>
    %c0_29 = arith.constant 0 : index
    %c143 = arith.constant 143 : index
    %74 = vector.load %arg14[%c0_29, %c143] : memref<8x512xf32, #tpu.memory_space<vmem>>, vector<8x256xf32>
    %cst_30 = arith.constant 0.000000e+00 : f32
    %75 = vector.shape_cast %18 : vector<1x256xi1> to vector<1x256xi1>
    %76 = vector.broadcast %75 : vector<1x256xi1> to vector<8x256xi1>
    %77 = vector.broadcast %cst_30 : f32 to vector<8x256xf32>
    %78 = arith.select %76, %74, %77 : vector<8x256xi1>, vector<8x256xf32>
    %c0_31 = arith.constant 0 : index
    %c6 = arith.constant 6 : index
    %79 = vector.load %arg1[%c0_31, %c6] : memref<8x9xf32, #tpu.memory_space<vmem>>, vector<8x1xf32>
    %80 = vector.broadcast %79 : vector<8x1xf32> to vector<8x256xf32>
    %81 = arith.mulf %78, %80 : vector<8x256xf32>
    %82 = arith.addf %73, %81 : vector<8x256xf32>
    %c0_32 = arith.constant 0 : index
    %c144 = arith.constant 144 : index
    %83 = vector.load %arg14[%c0_32, %c144] : memref<8x512xf32, #tpu.memory_space<vmem>>, vector<8x256xf32>
    %cst_33 = arith.constant 0.000000e+00 : f32
    %84 = vector.shape_cast %11 : vector<1x256xi1> to vector<1x256xi1>
    %85 = vector.broadcast %84 : vector<1x256xi1> to vector<8x256xi1>
    %86 = vector.broadcast %cst_33 : f32 to vector<8x256xf32>
    %87 = arith.select %85, %83, %86 : vector<8x256xi1>, vector<8x256xf32>
    %c0_34 = arith.constant 0 : index
    %c7 = arith.constant 7 : index
    %88 = vector.load %arg1[%c0_34, %c7] : memref<8x9xf32, #tpu.memory_space<vmem>>, vector<8x1xf32>
    %89 = vector.broadcast %88 : vector<8x1xf32> to vector<8x256xf32>
    %90 = arith.mulf %87, %89 : vector<8x256xf32>
    %91 = arith.addf %82, %90 : vector<8x256xf32>
    %c0_35 = arith.constant 0 : index
    %c145 = arith.constant 145 : index
    %92 = vector.load %arg14[%c0_35, %c145] : memref<8x512xf32, #tpu.memory_space<vmem>>, vector<8x256xf32>
    %cst_36 = arith.constant 0.000000e+00 : f32
    %93 = vector.shape_cast %19 : vector<1x256xi1> to vector<1x256xi1>
    %94 = vector.broadcast %93 : vector<1x256xi1> to vector<8x256xi1>
    %95 = vector.broadcast %cst_36 : f32 to vector<8x256xf32>
    %96 = arith.select %94, %92, %95 : vector<8x256xi1>, vector<8x256xf32>
    %c0_37 = arith.constant 0 : index
    %c8 = arith.constant 8 : index
    %97 = vector.load %arg1[%c0_37, %c8] : memref<8x9xf32, #tpu.memory_space<vmem>>, vector<8x1xf32>
    %98 = vector.broadcast %97 : vector<8x1xf32> to vector<8x256xf32>
    %99 = arith.mulf %96, %98 : vector<8x256xf32>
    %100 = arith.addf %91, %99 : vector<8x256xf32>
    %c0_38 = arith.constant 0 : index
    %c128_39 = arith.constant 128 : index
    %101 = vector.load %arg14[%c0_38, %c128_39] : memref<8x512xf32, #tpu.memory_space<vmem>>, vector<8x256xf32>
    tpu.vector_store %arg14[%c0_38, %c128_39], %100 {strides = array<i32>} : memref<8x512xf32, #tpu.memory_space<vmem>>, vector<8x256xf32>,
    %c0_40 = arith.constant 0 : index
    %c128_41 = arith.constant 128 : index
    %102 = vector.load %arg14[%c0_40, %c128_41] : memref<8x512xf32, #tpu.memory_space<vmem>>, vector<1x256xf32>
    %c0_42 = arith.constant 0 : index
    %c0_43 = arith.constant 0 : index
    %103 = vector.load %arg3[%c0_42, %c0_43] : memref<4x4xf32, #tpu.memory_space<vmem>>, vector<4x1xf32>
    %104 = vector.broadcast %103 : vector<4x1xf32> to vector<4x256xf32>
    %105 = vector.broadcast %102 : vector<1x256xf32> to vector<4x256xf32>
    %106 = arith.mulf %104, %105 : vector<4x256xf32>
    %c1_44 = arith.constant 1 : index
    %c128_45 = arith.constant 128 : index
    %107 = vector.load %arg14[%c1_44, %c128_45] : memref<8x512xf32, #tpu.memory_space<vmem>>, vector<1x256xf32>
    %c0_46 = arith.constant 0 : index
    %c1_47 = arith.constant 1 : index
    %108 = vector.load %arg3[%c0_46, %c1_47] : memref<4x4xf32, #tpu.memory_space<vmem>>, vector<4x1xf32>
    %109 = vector.broadcast %108 : vector<4x1xf32> to vector<4x256xf32>
    %110 = vector.broadcast %107 : vector<1x256xf32> to vector<4x256xf32>
    %111 = arith.mulf %109, %110 : vector<4x256xf32>
    %112 = arith.addf %106, %111 : vector<4x256xf32>
    %c2_48 = arith.constant 2 : index
    %c128_49 = arith.constant 128 : index
    %113 = vector.load %arg14[%c2_48, %c128_49] : memref<8x512xf32, #tpu.memory_space<vmem>>, vector<1x256xf32>
    %c0_50 = arith.constant 0 : index
    %c2_51 = arith.constant 2 : index
    %114 = vector.load %arg3[%c0_50, %c2_51] : memref<4x4xf32, #tpu.memory_space<vmem>>, vector<4x1xf32>
    %115 = vector.broadcast %114 : vector<4x1xf32> to vector<4x256xf32>
    %116 = vector.broadcast %113 : vector<1x256xf32> to vector<4x256xf32>
    %117 = arith.mulf %115, %116 : vector<4x256xf32>
    %118 = arith.addf %112, %117 : vector<4x256xf32>
    %c3_52 = arith.constant 3 : index
    %c128_53 = arith.constant 128 : index
    %119 = vector.load %arg14[%c3_52, %c128_53] : memref<8x512xf32, #tpu.memory_space<vmem>>, vector<1x256xf32>
    %c0_54 = arith.constant 0 : index
    %c3_55 = arith.constant 3 : index
    %120 = vector.load %arg3[%c0_54, %c3_55] : memref<4x4xf32, #tpu.memory_space<vmem>>, vector<4x1xf32>
    %121 = vector.broadcast %120 : vector<4x1xf32> to vector<4x256xf32>
    %122 = vector.broadcast %119 : vector<1x256xf32> to vector<4x256xf32>
    %123 = arith.mulf %121, %122 : vector<4x256xf32>
    %124 = arith.addf %118, %123 : vector<4x256xf32>
    %c0_56 = arith.constant 0 : index
    %c0_57 = arith.constant 0 : index
    %125 = vector.load %arg4[%c0_56, %c0_57] : memref<4x1xf32, #tpu.memory_space<vmem>>, vector<4x1xf32>
    %126 = vector.broadcast %125 : vector<4x1xf32> to vector<4x256xf32>
    %127 = arith.addf %124, %126 : vector<4x256xf32>
    %c4_58 = arith.constant 4 : index
    %c128_59 = arith.constant 128 : index
    %128 = vector.load %arg14[%c4_58, %c128_59] : memref<8x512xf32, #tpu.memory_space<vmem>>, vector<1x256xf32>
    %c0_60 = arith.constant 0 : index
    %c0_61 = arith.constant 0 : index
    %129 = vector.load %arg3[%c0_60, %c0_61] : memref<4x4xf32, #tpu.memory_space<vmem>>, vector<4x1xf32>
    %130 = vector.broadcast %129 : vector<4x1xf32> to vector<4x256xf32>
    %131 = vector.broadcast %128 : vector<1x256xf32> to vector<4x256xf32>
    %132 = arith.mulf %130, %131 : vector<4x256xf32>
    %c5_62 = arith.constant 5 : index
    %c128_63 = arith.constant 128 : index
    %133 = vector.load %arg14[%c5_62, %c128_63] : memref<8x512xf32, #tpu.memory_space<vmem>>, vector<1x256xf32>
    %c0_64 = arith.constant 0 : index
    %c1_65 = arith.constant 1 : index
    %134 = vector.load %arg3[%c0_64, %c1_65] : memref<4x4xf32, #tpu.memory_space<vmem>>, vector<4x1xf32>
    %135 = vector.broadcast %134 : vector<4x1xf32> to vector<4x256xf32>
    %136 = vector.broadcast %133 : vector<1x256xf32> to vector<4x256xf32>
    %137 = arith.mulf %135, %136 : vector<4x256xf32>
    %138 = arith.addf %132, %137 : vector<4x256xf32>
    %c6_66 = arith.constant 6 : index
    %c128_67 = arith.constant 128 : index
    %139 = vector.load %arg14[%c6_66, %c128_67] : memref<8x512xf32, #tpu.memory_space<vmem>>, vector<1x256xf32>
    %c0_68 = arith.constant 0 : index
    %c2_69 = arith.constant 2 : index
    %140 = vector.load %arg3[%c0_68, %c2_69] : memref<4x4xf32, #tpu.memory_space<vmem>>, vector<4x1xf32>
    %141 = vector.broadcast %140 : vector<4x1xf32> to vector<4x256xf32>
    %142 = vector.broadcast %139 : vector<1x256xf32> to vector<4x256xf32>
    %143 = arith.mulf %141, %142 : vector<4x256xf32>
    %144 = arith.addf %138, %143 : vector<4x256xf32>
    %c7_70 = arith.constant 7 : index
    %c128_71 = arith.constant 128 : index
    %145 = vector.load %arg14[%c7_70, %c128_71] : memref<8x512xf32, #tpu.memory_space<vmem>>, vector<1x256xf32>
    %c0_72 = arith.constant 0 : index
    %c3_73 = arith.constant 3 : index
    %146 = vector.load %arg3[%c0_72, %c3_73] : memref<4x4xf32, #tpu.memory_space<vmem>>, vector<4x1xf32>
    %147 = vector.broadcast %146 : vector<4x1xf32> to vector<4x256xf32>
    %148 = vector.broadcast %145 : vector<1x256xf32> to vector<4x256xf32>
    %149 = arith.mulf %147, %148 : vector<4x256xf32>
    %150 = arith.addf %144, %149 : vector<4x256xf32>
    %c0_74 = arith.constant 0 : index
    %c0_75 = arith.constant 0 : index
    %151 = vector.load %arg4[%c0_74, %c0_75] : memref<4x1xf32, #tpu.memory_space<vmem>>, vector<4x1xf32>
    %152 = vector.broadcast %151 : vector<4x1xf32> to vector<4x256xf32>
    %153 = arith.addf %150, %152 : vector<4x256xf32>
    %cst_76 = arith.constant dense<0.000000e+00> : vector<4xf32>
    %154 = vector.multi_reduction <add>, %127, %cst_76 [1] : vector<4x256xf32> to vector<4xf32>
    %155 = vector.shape_cast %154 : vector<4xf32> to vector<4x1xf32>
    %cst_77 = arith.constant dense<0.000000e+00> : vector<4xf32>
    %156 = vector.multi_reduction <add>, %153, %cst_77 [1] : vector<4x256xf32> to vector<4xf32>
    %157 = vector.shape_cast %156 : vector<4xf32> to vector<4x1xf32>
    %158 = arith.addf %155, %157 : vector<4x1xf32>
    %cst_78 = arith.constant 0.001953125 : f32
    %159 = vector.broadcast %cst_78 : f32 to vector<4x1xf32>
    %160 = arith.mulf %158, %159 : vector<4x1xf32>
    %161 = vector.broadcast %160 : vector<4x1xf32> to vector<4x256xf32>
    %162 = arith.subf %127, %161 : vector<4x256xf32>
    %163 = vector.broadcast %160 : vector<4x1xf32> to vector<4x256xf32>
    %164 = arith.subf %153, %163 : vector<4x256xf32>
    %165 = arith.mulf %162, %162 : vector<4x256xf32>
    %cst_79 = arith.constant dense<0.000000e+00> : vector<4xf32>
    %166 = vector.multi_reduction <add>, %165, %cst_79 [1] : vector<4x256xf32> to vector<4xf32>
    %167 = vector.shape_cast %166 : vector<4xf32> to vector<4x1xf32>
    %168 = arith.mulf %164, %164 : vector<4x256xf32>
    %cst_80 = arith.constant dense<0.000000e+00> : vector<4xf32>
    %169 = vector.multi_reduction <add>, %168, %cst_80 [1] : vector<4x256xf32> to vector<4xf32>
    %170 = vector.shape_cast %169 : vector<4xf32> to vector<4x1xf32>
    %171 = arith.addf %167, %170 : vector<4x1xf32>
    %cst_81 = arith.constant 0.001953125 : f32
    %172 = vector.broadcast %cst_81 : f32 to vector<4x1xf32>
    %173 = arith.mulf %171, %172 : vector<4x1xf32>
    %c0_82 = arith.constant 0 : index
    %c0_83 = arith.constant 0 : index
    %174 = vector.load %arg5[%c0_82, %c0_83] : memref<4x1xf32, #tpu.memory_space<vmem>>, vector<4x1xf32>
    %cst_84 = arith.constant 9.99999974E-6 : f32
    %175 = vector.broadcast %cst_84 : f32 to vector<4x1xf32>
    %176 = arith.addf %173, %175 : vector<4x1xf32>
    %177 = math.rsqrt %176 : vector<4x1xf32>
    %178 = arith.mulf %174, %177 : vector<4x1xf32>
    %179 = vector.broadcast %178 : vector<4x1xf32> to vector<4x256xf32>
    %180 = arith.mulf %162, %179 : vector<4x256xf32>
    %c0_85 = arith.constant 0 : index
    %c0_86 = arith.constant 0 : index
    %181 = vector.load %arg6[%c0_85, %c0_86] : memref<4x1xf32, #tpu.memory_space<vmem>>, vector<4x1xf32>
    %182 = vector.broadcast %181 : vector<4x1xf32> to vector<4x256xf32>
    %183 = arith.addf %180, %182 : vector<4x256xf32>
    %184 = vector.broadcast %178 : vector<4x1xf32> to vector<4x256xf32>
    %185 = arith.mulf %164, %184 : vector<4x256xf32>
    %c0_87 = arith.constant 0 : index
    %c0_88 = arith.constant 0 : index
    %186 = vector.load %arg6[%c0_87, %c0_88] : memref<4x1xf32, #tpu.memory_space<vmem>>, vector<4x1xf32>
    %187 = vector.broadcast %186 : vector<4x1xf32> to vector<4x256xf32>
    %188 = arith.addf %185, %187 : vector<4x256xf32>
    %cst_89 = arith.constant 0.000000e+00 : f32
    %189 = vector.broadcast %cst_89 : f32 to vector<4x256xf32>
    %190 = arith.maximumf %183, %189 : vector<4x256xf32>
    %cst_90 = arith.constant 0.000000e+00 : f32
    %191 = vector.broadcast %cst_90 : f32 to vector<4x256xf32>
    %192 = arith.maximumf %188, %191 : vector<4x256xf32>
    %c0_91 = arith.constant 0 : index
    %c128_92 = arith.constant 128 : index
    %193 = vector.load %arg14[%c0_91, %c128_92] : memref<8x512xf32, #tpu.memory_space<vmem>>, vector<4x256xf32>
    tpu.vector_store %arg14[%c0_91, %c128_92], %190 {strides = array<i32>} : memref<8x512xf32, #tpu.memory_space<vmem>>, vector<4x256xf32>,
    %c4_93 = arith.constant 4 : index
    %c128_94 = arith.constant 128 : index
    %194 = vector.load %arg14[%c4_93, %c128_94] : memref<8x512xf32, #tpu.memory_space<vmem>>, vector<4x256xf32>
    tpu.vector_store %arg14[%c4_93, %c128_94], %192 {strides = array<i32>} : memref<8x512xf32, #tpu.memory_space<vmem>>, vector<4x256xf32>,
    %c0_95 = arith.constant 0 : index
    %c128_96 = arith.constant 128 : index
    %195 = vector.load %arg14[%c0_95, %c128_96] : memref<8x512xf32, #tpu.memory_space<vmem>>, vector<8x256xf32>
    %c0_97 = arith.constant 0 : index
    %c4_98 = arith.constant 4 : index
    %196 = vector.load %arg7[%c0_97, %c4_98] : memref<8x9xf32, #tpu.memory_space<vmem>>, vector<8x1xf32>
    %197 = vector.broadcast %196 : vector<8x1xf32> to vector<8x256xf32>
    %198 = arith.mulf %195, %197 : vector<8x256xf32>
    %c0_99 = arith.constant 0 : index
    %c0_100 = arith.constant 0 : index
    %199 = vector.load %arg8[%c0_99, %c0_100] : memref<8x1xf32, #tpu.memory_space<vmem>>, vector<8x1xf32>
    %200 = vector.broadcast %199 : vector<8x1xf32> to vector<8x256xf32>
    %201 = arith.addf %198, %200 : vector<8x256xf32>
    %c0_101 = arith.constant 0 : index
    %c111_102 = arith.constant 111 : index
    %202 = vector.load %arg14[%c0_101, %c111_102] : memref<8x512xf32, #tpu.memory_space<vmem>>, vector<8x256xf32>
    %cst_103 = arith.constant 0.000000e+00 : f32
    %203 = vector.shape_cast %16 : vector<1x256xi1> to vector<1x256xi1>
    %204 = vector.broadcast %203 : vector<1x256xi1> to vector<8x256xi1>
    %205 = vector.broadcast %cst_103 : f32 to vector<8x256xf32>
    %206 = arith.select %204, %202, %205 : vector<8x256xi1>, vector<8x256xf32>
    %c0_104 = arith.constant 0 : index
    %c0_105 = arith.constant 0 : index
    %207 = vector.load %arg7[%c0_104, %c0_105] : memref<8x9xf32, #tpu.memory_space<vmem>>, vector<8x1xf32>
    %208 = vector.broadcast %207 : vector<8x1xf32> to vector<8x256xf32>
    %209 = arith.mulf %206, %208 : vector<8x256xf32>
    %210 = arith.addf %201, %209 : vector<8x256xf32>
    %c0_106 = arith.constant 0 : index
    %c112_107 = arith.constant 112 : index
    %211 = vector.load %arg14[%c0_106, %c112_107] : memref<8x512xf32, #tpu.memory_space<vmem>>, vector<8x256xf32>
    %cst_108 = arith.constant 0.000000e+00 : f32
    %212 = vector.shape_cast %9 : vector<1x256xi1> to vector<1x256xi1>
    %213 = vector.broadcast %212 : vector<1x256xi1> to vector<8x256xi1>
    %214 = vector.broadcast %cst_108 : f32 to vector<8x256xf32>
    %215 = arith.select %213, %211, %214 : vector<8x256xi1>, vector<8x256xf32>
    %c0_109 = arith.constant 0 : index
    %c1_110 = arith.constant 1 : index
    %216 = vector.load %arg7[%c0_109, %c1_110] : memref<8x9xf32, #tpu.memory_space<vmem>>, vector<8x1xf32>
    %217 = vector.broadcast %216 : vector<8x1xf32> to vector<8x256xf32>
    %218 = arith.mulf %215, %217 : vector<8x256xf32>
    %219 = arith.addf %210, %218 : vector<8x256xf32>
    %c0_111 = arith.constant 0 : index
    %c113_112 = arith.constant 113 : index
    %220 = vector.load %arg14[%c0_111, %c113_112] : memref<8x512xf32, #tpu.memory_space<vmem>>, vector<8x256xf32>
    %cst_113 = arith.constant 0.000000e+00 : f32
    %221 = vector.shape_cast %17 : vector<1x256xi1> to vector<1x256xi1>
    %222 = vector.broadcast %221 : vector<1x256xi1> to vector<8x256xi1>
    %223 = vector.broadcast %cst_113 : f32 to vector<8x256xf32>
    %224 = arith.select %222, %220, %223 : vector<8x256xi1>, vector<8x256xf32>
    %c0_114 = arith.constant 0 : index
    %c2_115 = arith.constant 2 : index
    %225 = vector.load %arg7[%c0_114, %c2_115] : memref<8x9xf32, #tpu.memory_space<vmem>>, vector<8x1xf32>
    %226 = vector.broadcast %225 : vector<8x1xf32> to vector<8x256xf32>
    %227 = arith.mulf %224, %226 : vector<8x256xf32>
    %228 = arith.addf %219, %227 : vector<8x256xf32>
    %c0_116 = arith.constant 0 : index
    %c127_117 = arith.constant 127 : index
    %229 = vector.load %arg14[%c0_116, %c127_117] : memref<8x512xf32, #tpu.memory_space<vmem>>, vector<8x256xf32>
    %cst_118 = arith.constant 0.000000e+00 : f32
    %230 = vector.shape_cast %13 : vector<1x256xi1> to vector<1x256xi1>
    %231 = vector.broadcast %230 : vector<1x256xi1> to vector<8x256xi1>
    %232 = vector.broadcast %cst_118 : f32 to vector<8x256xf32>
    %233 = arith.select %231, %229, %232 : vector<8x256xi1>, vector<8x256xf32>
    %c0_119 = arith.constant 0 : index
    %c3_120 = arith.constant 3 : index
    %234 = vector.load %arg7[%c0_119, %c3_120] : memref<8x9xf32, #tpu.memory_space<vmem>>, vector<8x1xf32>
    %235 = vector.broadcast %234 : vector<8x1xf32> to vector<8x256xf32>
    %236 = arith.mulf %233, %235 : vector<8x256xf32>
    %237 = arith.addf %228, %236 : vector<8x256xf32>
    %c0_121 = arith.constant 0 : index
    %c129_122 = arith.constant 129 : index
    %238 = vector.load %arg14[%c0_121, %c129_122] : memref<8x512xf32, #tpu.memory_space<vmem>>, vector<8x256xf32>
    %cst_123 = arith.constant 0.000000e+00 : f32
    %239 = vector.shape_cast %15 : vector<1x256xi1> to vector<1x256xi1>
    %240 = vector.broadcast %239 : vector<1x256xi1> to vector<8x256xi1>
    %241 = vector.broadcast %cst_123 : f32 to vector<8x256xf32>
    %242 = arith.select %240, %238, %241 : vector<8x256xi1>, vector<8x256xf32>
    %c0_124 = arith.constant 0 : index
    %c5_125 = arith.constant 5 : index
    %243 = vector.load %arg7[%c0_124, %c5_125] : memref<8x9xf32, #tpu.memory_space<vmem>>, vector<8x1xf32>
    %244 = vector.broadcast %243 : vector<8x1xf32> to vector<8x256xf32>
    %245 = arith.mulf %242, %244 : vector<8x256xf32>
    %246 = arith.addf %237, %245 : vector<8x256xf32>
    %c0_126 = arith.constant 0 : index
    %c143_127 = arith.constant 143 : index
    %247 = vector.load %arg14[%c0_126, %c143_127] : memref<8x512xf32, #tpu.memory_space<vmem>>, vector<8x256xf32>
    %cst_128 = arith.constant 0.000000e+00 : f32
    %248 = vector.shape_cast %18 : vector<1x256xi1> to vector<1x256xi1>
    %249 = vector.broadcast %248 : vector<1x256xi1> to vector<8x256xi1>
    %250 = vector.broadcast %cst_128 : f32 to vector<8x256xf32>
    %251 = arith.select %249, %247, %250 : vector<8x256xi1>, vector<8x256xf32>
    %c0_129 = arith.constant 0 : index
    %c6_130 = arith.constant 6 : index
    %252 = vector.load %arg7[%c0_129, %c6_130] : memref<8x9xf32, #tpu.memory_space<vmem>>, vector<8x1xf32>
    %253 = vector.broadcast %252 : vector<8x1xf32> to vector<8x256xf32>
    %254 = arith.mulf %251, %253 : vector<8x256xf32>
    %255 = arith.addf %246, %254 : vector<8x256xf32>
    %c0_131 = arith.constant 0 : index
    %c144_132 = arith.constant 144 : index
    %256 = vector.load %arg14[%c0_131, %c144_132] : memref<8x512xf32, #tpu.memory_space<vmem>>, vector<8x256xf32>
    %cst_133 = arith.constant 0.000000e+00 : f32
    %257 = vector.shape_cast %11 : vector<1x256xi1> to vector<1x256xi1>
    %258 = vector.broadcast %257 : vector<1x256xi1> to vector<8x256xi1>
    %259 = vector.broadcast %cst_133 : f32 to vector<8x256xf32>
    %260 = arith.select %258, %256, %259 : vector<8x256xi1>, vector<8x256xf32>
    %c0_134 = arith.constant 0 : index
    %c7_135 = arith.constant 7 : index
    %261 = vector.load %arg7[%c0_134, %c7_135] : memref<8x9xf32, #tpu.memory_space<vmem>>, vector<8x1xf32>
    %262 = vector.broadcast %261 : vector<8x1xf32> to vector<8x256xf32>
    %263 = arith.mulf %260, %262 : vector<8x256xf32>
    %264 = arith.addf %255, %263 : vector<8x256xf32>
    %c0_136 = arith.constant 0 : index
    %c145_137 = arith.constant 145 : index
    %265 = vector.load %arg14[%c0_136, %c145_137] : memref<8x512xf32, #tpu.memory_space<vmem>>, vector<8x256xf32>
    %cst_138 = arith.constant 0.000000e+00 : f32
    %266 = vector.shape_cast %19 : vector<1x256xi1> to vector<1x256xi1>
    %267 = vector.broadcast %266 : vector<1x256xi1> to vector<8x256xi1>
    %268 = vector.broadcast %cst_138 : f32 to vector<8x256xf32>
    %269 = arith.select %267, %265, %268 : vector<8x256xi1>, vector<8x256xf32>
    %c0_139 = arith.constant 0 : index
    %c8_140 = arith.constant 8 : index
    %270 = vector.load %arg7[%c0_139, %c8_140] : memref<8x9xf32, #tpu.memory_space<vmem>>, vector<8x1xf32>
    %271 = vector.broadcast %270 : vector<8x1xf32> to vector<8x256xf32>
    %272 = arith.mulf %269, %271 : vector<8x256xf32>
    %273 = arith.addf %264, %272 : vector<8x256xf32>
    %c0_141 = arith.constant 0 : index
    %c128_142 = arith.constant 128 : index
    %274 = vector.load %arg14[%c0_141, %c128_142] : memref<8x512xf32, #tpu.memory_space<vmem>>, vector<8x256xf32>
    tpu.vector_store %arg14[%c0_141, %c128_142], %273 {strides = array<i32>} : memref<8x512xf32, #tpu.memory_space<vmem>>, vector<8x256xf32>,
    %c0_143 = arith.constant 0 : index
    %c128_144 = arith.constant 128 : index
    %275 = vector.load %arg14[%c0_143, %c128_144] : memref<8x512xf32, #tpu.memory_space<vmem>>, vector<1x256xf32>
    %c0_145 = arith.constant 0 : index
    %c0_146 = arith.constant 0 : index
    %276 = vector.load %arg9[%c0_145, %c0_146] : memref<4x4xf32, #tpu.memory_space<vmem>>, vector<4x1xf32>
    %277 = vector.broadcast %276 : vector<4x1xf32> to vector<4x256xf32>
    %278 = vector.broadcast %275 : vector<1x256xf32> to vector<4x256xf32>
    %279 = arith.mulf %277, %278 : vector<4x256xf32>
    %c1_147 = arith.constant 1 : index
    %c128_148 = arith.constant 128 : index
    %280 = vector.load %arg14[%c1_147, %c128_148] : memref<8x512xf32, #tpu.memory_space<vmem>>, vector<1x256xf32>
    %c0_149 = arith.constant 0 : index
    %c1_150 = arith.constant 1 : index
    %281 = vector.load %arg9[%c0_149, %c1_150] : memref<4x4xf32, #tpu.memory_space<vmem>>, vector<4x1xf32>
    %282 = vector.broadcast %281 : vector<4x1xf32> to vector<4x256xf32>
    %283 = vector.broadcast %280 : vector<1x256xf32> to vector<4x256xf32>
    %284 = arith.mulf %282, %283 : vector<4x256xf32>
    %285 = arith.addf %279, %284 : vector<4x256xf32>
    %c2_151 = arith.constant 2 : index
    %c128_152 = arith.constant 128 : index
    %286 = vector.load %arg14[%c2_151, %c128_152] : memref<8x512xf32, #tpu.memory_space<vmem>>, vector<1x256xf32>
    %c0_153 = arith.constant 0 : index
    %c2_154 = arith.constant 2 : index
    %287 = vector.load %arg9[%c0_153, %c2_154] : memref<4x4xf32, #tpu.memory_space<vmem>>, vector<4x1xf32>
    %288 = vector.broadcast %287 : vector<4x1xf32> to vector<4x256xf32>
    %289 = vector.broadcast %286 : vector<1x256xf32> to vector<4x256xf32>
    %290 = arith.mulf %288, %289 : vector<4x256xf32>
    %291 = arith.addf %285, %290 : vector<4x256xf32>
    %c3_155 = arith.constant 3 : index
    %c128_156 = arith.constant 128 : index
    %292 = vector.load %arg14[%c3_155, %c128_156] : memref<8x512xf32, #tpu.memory_space<vmem>>, vector<1x256xf32>
    %c0_157 = arith.constant 0 : index
    %c3_158 = arith.constant 3 : index
    %293 = vector.load %arg9[%c0_157, %c3_158] : memref<4x4xf32, #tpu.memory_space<vmem>>, vector<4x1xf32>
    %294 = vector.broadcast %293 : vector<4x1xf32> to vector<4x256xf32>
    %295 = vector.broadcast %292 : vector<1x256xf32> to vector<4x256xf32>
    %296 = arith.mulf %294, %295 : vector<4x256xf32>
    %297 = arith.addf %291, %296 : vector<4x256xf32>
    %c0_159 = arith.constant 0 : index
    %c0_160 = arith.constant 0 : index
    %298 = vector.load %arg10[%c0_159, %c0_160] : memref<4x1xf32, #tpu.memory_space<vmem>>, vector<4x1xf32>
    %299 = vector.broadcast %298 : vector<4x1xf32> to vector<4x256xf32>
    %300 = arith.addf %297, %299 : vector<4x256xf32>
    %c4_161 = arith.constant 4 : index
    %c128_162 = arith.constant 128 : index
    %301 = vector.load %arg14[%c4_161, %c128_162] : memref<8x512xf32, #tpu.memory_space<vmem>>, vector<1x256xf32>
    %c0_163 = arith.constant 0 : index
    %c0_164 = arith.constant 0 : index
    %302 = vector.load %arg9[%c0_163, %c0_164] : memref<4x4xf32, #tpu.memory_space<vmem>>, vector<4x1xf32>
    %303 = vector.broadcast %302 : vector<4x1xf32> to vector<4x256xf32>
    %304 = vector.broadcast %301 : vector<1x256xf32> to vector<4x256xf32>
    %305 = arith.mulf %303, %304 : vector<4x256xf32>
    %c5_165 = arith.constant 5 : index
    %c128_166 = arith.constant 128 : index
    %306 = vector.load %arg14[%c5_165, %c128_166] : memref<8x512xf32, #tpu.memory_space<vmem>>, vector<1x256xf32>
    %c0_167 = arith.constant 0 : index
    %c1_168 = arith.constant 1 : index
    %307 = vector.load %arg9[%c0_167, %c1_168] : memref<4x4xf32, #tpu.memory_space<vmem>>, vector<4x1xf32>
    %308 = vector.broadcast %307 : vector<4x1xf32> to vector<4x256xf32>
    %309 = vector.broadcast %306 : vector<1x256xf32> to vector<4x256xf32>
    %310 = arith.mulf %308, %309 : vector<4x256xf32>
    %311 = arith.addf %305, %310 : vector<4x256xf32>
    %c6_169 = arith.constant 6 : index
    %c128_170 = arith.constant 128 : index
    %312 = vector.load %arg14[%c6_169, %c128_170] : memref<8x512xf32, #tpu.memory_space<vmem>>, vector<1x256xf32>
    %c0_171 = arith.constant 0 : index
    %c2_172 = arith.constant 2 : index
    %313 = vector.load %arg9[%c0_171, %c2_172] : memref<4x4xf32, #tpu.memory_space<vmem>>, vector<4x1xf32>
    %314 = vector.broadcast %313 : vector<4x1xf32> to vector<4x256xf32>
    %315 = vector.broadcast %312 : vector<1x256xf32> to vector<4x256xf32>
    %316 = arith.mulf %314, %315 : vector<4x256xf32>
    %317 = arith.addf %311, %316 : vector<4x256xf32>
    %c7_173 = arith.constant 7 : index
    %c128_174 = arith.constant 128 : index
    %318 = vector.load %arg14[%c7_173, %c128_174] : memref<8x512xf32, #tpu.memory_space<vmem>>, vector<1x256xf32>
    %c0_175 = arith.constant 0 : index
    %c3_176 = arith.constant 3 : index
    %319 = vector.load %arg9[%c0_175, %c3_176] : memref<4x4xf32, #tpu.memory_space<vmem>>, vector<4x1xf32>
    %320 = vector.broadcast %319 : vector<4x1xf32> to vector<4x256xf32>
    %321 = vector.broadcast %318 : vector<1x256xf32> to vector<4x256xf32>
    %322 = arith.mulf %320, %321 : vector<4x256xf32>
    %323 = arith.addf %317, %322 : vector<4x256xf32>
    %c0_177 = arith.constant 0 : index
    %c0_178 = arith.constant 0 : index
    %324 = vector.load %arg10[%c0_177, %c0_178] : memref<4x1xf32, #tpu.memory_space<vmem>>, vector<4x1xf32>
    %325 = vector.broadcast %324 : vector<4x1xf32> to vector<4x256xf32>
    %326 = arith.addf %323, %325 : vector<4x256xf32>
    %cst_179 = arith.constant dense<0.000000e+00> : vector<4xf32>
    %327 = vector.multi_reduction <add>, %300, %cst_179 [1] : vector<4x256xf32> to vector<4xf32>
    %328 = vector.shape_cast %327 : vector<4xf32> to vector<4x1xf32>
    %cst_180 = arith.constant dense<0.000000e+00> : vector<4xf32>
    %329 = vector.multi_reduction <add>, %326, %cst_180 [1] : vector<4x256xf32> to vector<4xf32>
    %330 = vector.shape_cast %329 : vector<4xf32> to vector<4x1xf32>
    %331 = arith.addf %328, %330 : vector<4x1xf32>
    %cst_181 = arith.constant 0.001953125 : f32
    %332 = vector.broadcast %cst_181 : f32 to vector<4x1xf32>
    %333 = arith.mulf %331, %332 : vector<4x1xf32>
    %334 = vector.broadcast %333 : vector<4x1xf32> to vector<4x256xf32>
    %335 = arith.subf %300, %334 : vector<4x256xf32>
    %336 = vector.broadcast %333 : vector<4x1xf32> to vector<4x256xf32>
    %337 = arith.subf %326, %336 : vector<4x256xf32>
    %338 = arith.mulf %335, %335 : vector<4x256xf32>
    %cst_182 = arith.constant dense<0.000000e+00> : vector<4xf32>
    %339 = vector.multi_reduction <add>, %338, %cst_182 [1] : vector<4x256xf32> to vector<4xf32>
    %340 = vector.shape_cast %339 : vector<4xf32> to vector<4x1xf32>
    %341 = arith.mulf %337, %337 : vector<4x256xf32>
    %cst_183 = arith.constant dense<0.000000e+00> : vector<4xf32>
    %342 = vector.multi_reduction <add>, %341, %cst_183 [1] : vector<4x256xf32> to vector<4xf32>
    %343 = vector.shape_cast %342 : vector<4xf32> to vector<4x1xf32>
    %344 = arith.addf %340, %343 : vector<4x1xf32>
    %cst_184 = arith.constant 0.001953125 : f32
    %345 = vector.broadcast %cst_184 : f32 to vector<4x1xf32>
    %346 = arith.mulf %344, %345 : vector<4x1xf32>
    %c0_185 = arith.constant 0 : index
    %c0_186 = arith.constant 0 : index
    %347 = vector.load %arg11[%c0_185, %c0_186] : memref<4x1xf32, #tpu.memory_space<vmem>>, vector<4x1xf32>
    %cst_187 = arith.constant 9.99999974E-6 : f32
    %348 = vector.broadcast %cst_187 : f32 to vector<4x1xf32>
    %349 = arith.addf %346, %348 : vector<4x1xf32>
    %350 = math.rsqrt %349 : vector<4x1xf32>
    %351 = arith.mulf %347, %350 : vector<4x1xf32>
    %352 = vector.broadcast %351 : vector<4x1xf32> to vector<4x256xf32>
    %353 = arith.mulf %335, %352 : vector<4x256xf32>
    %c0_188 = arith.constant 0 : index
    %c0_189 = arith.constant 0 : index
    %354 = vector.load %arg12[%c0_188, %c0_189] : memref<4x1xf32, #tpu.memory_space<vmem>>, vector<4x1xf32>
    %355 = vector.broadcast %354 : vector<4x1xf32> to vector<4x256xf32>
    %356 = arith.addf %353, %355 : vector<4x256xf32>
    %357 = vector.broadcast %351 : vector<4x1xf32> to vector<4x256xf32>
    %358 = arith.mulf %337, %357 : vector<4x256xf32>
    %c0_190 = arith.constant 0 : index
    %c0_191 = arith.constant 0 : index
    %359 = vector.load %arg12[%c0_190, %c0_191] : memref<4x1xf32, #tpu.memory_space<vmem>>, vector<4x1xf32>
    %360 = vector.broadcast %359 : vector<4x1xf32> to vector<4x256xf32>
    %361 = arith.addf %358, %360 : vector<4x256xf32>
    %c0_192 = arith.constant 0 : index
    %c0_193 = arith.constant 0 : index
    %362 = vector.load %arg0[%c0_192, %c0_193] : memref<8x256xf32, #tpu.memory_space<vmem>>, vector<4x256xf32>
    %363 = arith.addf %356, %362 : vector<4x256xf32>
    %cst_194 = arith.constant 0.000000e+00 : f32
    %364 = vector.broadcast %cst_194 : f32 to vector<4x256xf32>
    %365 = arith.maximumf %363, %364 : vector<4x256xf32>
    %c0_195 = arith.constant 0 : index
    %c0_196 = arith.constant 0 : index
    %366 = vector.load %arg13[%c0_195, %c0_196] : memref<8x256xf32, #tpu.memory_space<vmem>>, vector<4x256xf32>
    tpu.vector_store %arg13[%c0_195, %c0_196], %365 {strides = array<i32>} : memref<8x256xf32, #tpu.memory_space<vmem>>, vector<4x256xf32>,
    %c4_197 = arith.constant 4 : index
    %c0_198 = arith.constant 0 : index
    %367 = vector.load %arg0[%c4_197, %c0_198] : memref<8x256xf32, #tpu.memory_space<vmem>>, vector<4x256xf32>
    %368 = arith.addf %361, %367 : vector<4x256xf32>
    %cst_199 = arith.constant 0.000000e+00 : f32
    %369 = vector.broadcast %cst_199 : f32 to vector<4x256xf32>
    %370 = arith.maximumf %368, %369 : vector<4x256xf32>
    %c4_200 = arith.constant 4 : index
    %c0_201 = arith.constant 0 : index
    %371 = vector.load %arg13[%c4_200, %c0_201] : memref<8x256xf32, #tpu.memory_space<vmem>>, vector<4x256xf32>
    tpu.vector_store %arg13[%c4_200, %c0_201], %370 {strides = array<i32>} : memref<8x256xf32, #tpu.memory_space<vmem>>, vector<4x256xf32>,
    return
  }
}

</mosaic_0001>

<bundles_post_ra>
// kernel: tpu_custom_call.1
= control target key start
LH: loop header
LB: loop body
LE: loop exit
PB: predicated region body
PF: predicated region fallthrough
CT: control target
= control target key end

     0   :  { %v1048_v1 = vmov 0   ;;  %v1049_v2 = vmov 4   ;;  %s1631_s0 = inlined_call_operand.vmem [shape: f32[8,256], index: 0, kind: input, shape index: {}]   ;;  %s1632_s1 = inlined_call_operand.vmem [shape: f32[8,9], index: 1, kind: input, shape index: {}]   ;;  %s1633_s2 = inlined_call_operand.vmem [shape: f32[8,1], index: 2, kind: input, shape index: {}]   ;;  %s1634_s3 = inlined_call_operand.vmem [shape: f32[4,4], index: 3, kind: input, shape index: {}]   ;;  %s1635_s4 = inlined_call_operand.vmem [shape: f32[4,1], index: 4, kind: input, shape index: {}]   ;;  %s1636_s5 = inlined_call_operand.vmem [shape: f32[4,1], index: 5, kind: input, shape index: {}]   ;;  %s1637_s6 = inlined_call_operand.vmem [shape: f32[4,1], index: 6, kind: input, shape index: {}]   ;;  %s1638_s7 = inlined_call_operand.vmem [shape: f32[8,9], index: 7, kind: input, shape index: {}]   ;;  %s1639_s8 = inlined_call_operand.vmem [shape: f32[8,1], index: 8, kind: input, shape index: {}]   ;;  %s1640_s9 = inlined_call_operand.vmem [shape: f32[4,4], index: 9, kind: input, shape index: {}]   ;;  %s1641_s10 = inlined_call_operand.vmem [shape: f32[4,1], index: 10, kind: input, shape index: {}]   ;;  %s1642_s11 = inlined_call_operand.vmem [shape: f32[4,1], index: 11, kind: input, shape index: {}]   ;;  %s1643_s12 = inlined_call_operand.vmem [shape: f32[4,1], index: 12, kind: input, shape index: {}]   ;;  %s1644_s13 = inlined_call_operand.hbm [shape: f32[8,256], index: 13, kind: output, shape index: {}]  }
   0x1   :  { %v76_v0 = vld [vmem:[%s1632_s1] sm:$0xff]  ;;  %993 = vset.pattern.permute.xlu1 %v1048_v1  ;;  %992 = vset.pattern.permute.xlu0 %v1049_v2 }
   0x2   :  { %114 = vperm.xlu1 %993, %v76_v0   ;;  %79 = vperm.xlu0 %992, %v76_v0   ;;  %v1145_v3 = vld [vmem:[%s1631_s0] sm:$0xff] }
   0x3   :  { %18 = vsyncpa [#allocation4], 0  ;;  %v1050_v4 = vmov 1   ;;  %s1051_s29 = smov 17   ;;  %v1052_v5 = vmov 2   ;;  %v1053_v6 = vmov 0.0   ;;  %v47_v32 = vlaneseq }
   0x4   :  { %v1156_v7 = vld [vmem:[%s1631_s0 + $0x8] sm:$0xff]  ;;  %v84_v8 = vld [vmem:[%s1633_s2] sm:$0xff]  ;;  %v1054_v9 = vmov 3   ;;  %s1055_s16 = smov 16   ;;  %s1056_s2 = smov 15   ;;  %v1058_v10 = vmov 5  }
   0x5   :  { %s1057_s17 = smov 1   ;;  %s1059_s18 = smov 127   ;;  %v1060_v11 = vmov 6   ;;  %v1062_v12 = vmov 7   ;;  %v1064_v13 = vmov 8   ;;  %v48_v35 = vand.u32 127, %v47_v32 }
   0x6   :  { %994 = vset.pattern.permute.xlu1 %v1050_v4  ;;  %102 = vrot.lane.b32.xlu0 %v1145_v3, %s1051_s29  ;;  %s1061_s19 = smov 113   ;;  %s1063_s20 = smov 112   ;;  %v306_v14 = vld [vmem:[%s1634_s3] sm:$0xf]  ;;  %vm106_vm2 = vcmask 138240   ;;  %vm131_vm3 = vcmask 130048  }
   0x7   :  { %139 = vperm.xlu1 %994, %v76_v0   ;;  %995 = vset.pattern.permute.xlu0 %v1052_v5  ;;  %s1065_s21 = smov 111   ;;  %v388_v15 = vld [vmem:[%s1635_s4] sm:$0xf]  ;;  %v49_v38 = vadd.s32 128, %v48_v35  ;;  %v50_v39 = vand.u32 15, %v48_v35  ;;  %v52_v40 = vshra.s32 %v48_v35, 4 }
   0x8   :  { %vm1647_vm8 = vcmask 121856   ;;  %vm1649_vm10 = vcmask 7168   ;;  %vm212_vm13 = vcmask 1039360   ;;  %vm237_vm15 = vcmask 924672  }
   0x9   :  { %v51_v43 = vand.u32 15, %v49_v38  ;;  %v53_v44 = vshra.s32 %v49_v38, 4  ;;  %vm1239_vm0 = vcmp.gt.s32.totalorder %v52_v40, 0  ;;  %vm1243_vm1 = vcmp.gt.s32.totalorder %v50_v39, 0 }
   0xa   :  { %164 = vperm.xlu0 %995, %v76_v0   ;;  %vm62_vm6 = vmand %vm1239_vm0, %vm1243_vm1  ;;  %vm1260_vm7 = vcmp.lt.s32.totalorder %v50_v39, 15  ;;  %vm1304_vm14 = vcmp.lt.s32.totalorder %v52_v40, 15 }
   0xb   :  { %100 = vrot.lane.b32.xlu1 %v1053_v6, %s1051_s29  ;;  %vm1247_vm4 = vcmp.gt.s32.totalorder %v53_v44, 0  ;;  %vm1251_vm5 = vcmp.gt.s32.totalorder %v51_v43, 0  ;;  %vm1646_vm11 = vmand %vm1239_vm0, %vm1260_vm7  ;;  %vm1287_vm12 = vcmp.lt.s32.totalorder %v51_v43, 15 }
   0xc   :  { %997 = vset.pattern.permute.xlu1 %v1054_v9  ;;  %vm1645_vm9 = vmand %vm1247_vm4, %vm1251_vm5 }
   0xe   :  { %996 = vset.pattern.permute.xlu0 %v1048_v1 }
   0xf   :  { %104 = vrot.lane.b32.xlu1 %v1156_v7, %s1051_s29  ;;  %87 = vperm.xlu0 %996, %v84_v8  }
  0x13   :  { %125 = vrot.lane.b32.xlu1 %v1053_v6, %s1055_s16  ;;  %129 = vrot.lane.b32.xlu0 %v1156_v7, %s1055_s16 }
  0x17   :  { %127 = vrot.lane.b32.xlu1 %v1145_v3, %s1055_s16  ;;  %150 = vrot.lane.b32.xlu0 %v1053_v6, %s1056_s2 }
  0x1b   :  { %189 = vperm.xlu1 %997, %v76_v0   ;;  %154 = vrot.lane.b32.xlu0 %v1156_v7, %s1056_s2 }
  0x1f   :  { %152 = vrot.lane.b32.xlu1 %v1145_v3, %s1056_s2  ;;  %175 = vrot.lane.b32.xlu0 %v1053_v6, %s1057_s17 }
  0x20   :  { %998 = vset.pattern.permute.xlu1 %v1058_v10 }
  0x23   :  { %220 = vperm.xlu1 %998, %v76_v0   ;;  %179 = vrot.lane.b32.xlu0 %v1156_v7, %s1057_s17 }
  0x27   :  { %177 = vrot.lane.b32.xlu1 %v1145_v3, %s1057_s17  ;;  %206 = vrot.lane.b32.xlu0 %v1145_v3, %s1059_s18 }
  0x28   :  { %999 = vset.pattern.permute.xlu1 %v1060_v11 }
  0x2b   :  { %245 = vperm.xlu1 %999, %v76_v0   ;;  %210 = vrot.lane.b32.xlu0 %v1053_v6, %s1059_s18 }
  0x2f   :  { %208 = vrot.lane.b32.xlu1 %v1156_v7, %s1059_s18  ;;  %231 = vrot.lane.b32.xlu0 %v1145_v3, %s1061_s19 }
  0x30   :  { %1000 = vset.pattern.permute.xlu1 %v1062_v12 }
  0x33   :  { %270 = vperm.xlu1 %1000, %v76_v0   ;;  %235 = vrot.lane.b32.xlu0 %v1053_v6, %s1061_s19 }
  0x37   :  { %233 = vrot.lane.b32.xlu1 %v1156_v7, %s1061_s19  ;;  %256 = vrot.lane.b32.xlu0 %v1145_v3, %s1063_s20 }
  0x38   :  { %1001 = vset.pattern.permute.xlu1 %v1064_v13 }
  0x3b   :  { %295 = vperm.xlu1 %1001, %v76_v0   ;;  %260 = vrot.lane.b32.xlu0 %v1053_v6, %s1063_s20 }
  0x3f   :  { %283 = vrot.lane.b32.xlu0 %v1156_v7, %s1065_s21  ;;  %258 = vrot.lane.b32.xlu1 %v1156_v7, %s1063_s20 }
  0x40   :  { %1002 = vset.pattern.permute.xlu1 %v1050_v4 }
  0x43   :  { %309 = vperm.xlu0 %996, %v306_v14   ;;  %281 = vrot.lane.b32.xlu1 %v1145_v3, %s1065_s21 }
  0x47   :  { %285 = vrot.lane.b32.xlu1 %v1053_v6, %s1065_s21  ;;  %1004 = vset.pattern.permute.xlu0 %v1054_v9 }
  0x48   :  { %370 = vperm.xlu0 %1004, %v306_v14  }
  0x4b   :  { %328 = vperm.xlu1 %1002, %v306_v14  }
  0x4c   :  { %1006 = vset.pattern.permute.xlu0 %v1048_v1 }
  0x4f   :  { %1003 = vset.pattern.permute.xlu1 %v1052_v5 }
  0x50   :  { %349 = vperm.xlu1 %1003, %v306_v14  }
  0x54   :  { %1005 = vset.pattern.permute.xlu1 %v1048_v1 }
  0x55   :  { %391 = vperm.xlu1 %1005, %v388_v15  }
  0x7d   :  { %v1222_v16 = vpop.permute.xlu1 %114  ;;  %v1224_v17 = vpop.permute.xlu0 %79 }
  0x7e   :  { %v82_v57 = vmul.f32 %v1224_v17, %v1145_v3 }
  0x81   :  { %v103_v18 = vpop.permute.xlu0 %102 }
  0x82   :  { %v1226_v19 = vpop.permute.xlu1 %139 }
  0x85   :  { %v1228_v20 = vpop.permute.xlu0 %164 }
  0x86   :  { %v101_v21 = vpop.permute.xlu1 %100 }
  0x87   :  { %v107_v51 = vsel %vm106_vm2, %v101_v21, %v103_v18 }
  0x88   :  { %v111_v58 = vsel %vm62_vm6, %v107_v51, 0.0 }
  0x89   :  { %v117_v8 = vmul.f32 %v1222_v16, %v111_v58 }
  0x8a   :  { %v105_v22 = vpop.permute.xlu1 %104  ;;  %v1230_v23 = vpop.permute.xlu0 %87 }
  0x8b   :  { %v108_v54 = vsel %vm106_vm2, %v103_v18, %v105_v22  ;;  %v90_v0 = vadd.f32 %v1230_v23, %v82_v57 }
  0x8c   :  { %v112_v63 = vsel %vm1645_vm9, %v108_v54, 0.0  ;;  %vm1648_vm9 = vmand %vm1247_vm4, %vm1287_vm12 }
  0x8d   :  { %v119_v39 = vadd.f32 %v117_v8, %v90_v0 }
  0x8e   :  { %v126_v24 = vpop.permute.xlu1 %125  ;;  %v130_v25 = vpop.permute.xlu0 %129 }
  0x92   :  { %v128_v26 = vpop.permute.xlu1 %127  ;;  %v151_v27 = vpop.permute.xlu0 %150 }
  0x93   :  { %v132_v53 = vsel %vm131_vm3, %v126_v24, %v128_v26  ;;  %v133_v60 = vsel %vm131_vm3, %v128_v26, %v130_v25 }
  0x94   :  { %v136_v61 = vsel %vm1239_vm0, %v132_v53, 0.0  ;;  %v137_v22 = vsel %vm1247_vm4, %v133_v60, 0.0 }
  0x95   :  { %v142_v24 = vmul.f32 %v1226_v19, %v136_v61 }
  0x96   :  { %v1232_v28 = vpop.permute.xlu1 %189  ;;  %v155_v29 = vpop.permute.xlu0 %154 }
  0x9a   :  { %v153_v30 = vpop.permute.xlu1 %152  ;;  %v176_v31 = vpop.permute.xlu0 %175 }
  0x9b   :  { %v157_v59 = vsel %vm1647_vm8, %v151_v27, %v153_v30  ;;  %v158_v25 = vsel %vm1647_vm8, %v153_v30, %v155_v29  ;;  %v83_v27 = vmul.f32 %v1224_v17, %v1156_v7  ;;  %vm1650_vm8 = vmand %vm1304_vm14, %vm1243_vm1  ;;  %v143_v17 = vmul.f32 %v1226_v19, %v137_v22 }
  0x9c   :  { %v161_v14 = vsel %vm1646_vm11, %v157_v59, 0.0  ;;  %vm1324_vm11 = vcmp.lt.s32.totalorder %v53_v44, 15  ;;  %v162_v29 = vsel %vm1648_vm9, %v158_v25, 0.0  ;;  %vm1651_vm9 = vcmask 916480  }
  0x9d   :  { %v167_v40 = vmul.f32 %v1228_v20, %v161_v14  ;;  %v168_v53 = vmul.f32 %v1228_v20, %v162_v29 }
  0x9e   :  { %v1234_v33 = vpop.permute.xlu1 %220  ;;  %v180_v34 = vpop.permute.xlu0 %179 }
  0xa2   :  { %v178_v36 = vpop.permute.xlu1 %177  ;;  %v207_v37 = vpop.permute.xlu0 %206 }
  0xa3   :  { %v182_v3 = vsel %vm1649_vm10, %v176_v31, %v178_v36  ;;  %v118_v31 = vmul.f32 %v1222_v16, %v112_v63  ;;  %v183_v35 = vsel %vm1649_vm10, %v178_v36, %v180_v34  ;;  %v91_v16 = vadd.f32 %v1230_v23, %v83_v27  ;;  %vm1652_vm10 = vmand %vm1324_vm11, %vm1251_vm5 }
  0xa4   :  { %v186_v38 = vsel %vm1243_vm1, %v182_v3, 0.0  ;;  %v144_v36 = vadd.f32 %v142_v24, %v119_v39 }
  0xa5   :  { %v192_v44 = vmul.f32 %v1232_v28, %v186_v38 }
  0xa6   :  { %v1237_v41 = vpop.permute.xlu1 %245  ;;  %v211_v42 = vpop.permute.xlu0 %210  ;;  %v169_v54 = vadd.f32 %v167_v40, %v144_v36 }
  0xa8   :  { %v194_v61 = vadd.f32 %v192_v44, %v169_v54 }
  0xaa   :  { %v209_v47 = vpop.permute.xlu1 %208  ;;  %v232_v48 = vpop.permute.xlu0 %231 }
  0xab   :  { %v213_v26 = vsel %vm212_vm13, %v207_v37, %v209_v47  ;;  %v187_v37 = vsel %vm1251_vm5, %v183_v35, 0.0  ;;  %v214_v23 = vsel %vm212_vm13, %v209_v47, %v211_v42 }
  0xac   :  { %v217_v30 = vsel %vm1260_vm7, %v213_v26, 0.0  ;;  %v193_v58 = vmul.f32 %v1232_v28, %v187_v37  ;;  %v218_v59 = vsel %vm1287_vm12, %v214_v23, 0.0  ;;  %v314_v37 = vshrl.u32 %v47_v32, 7 }
  0xad   :  { %v223_v57 = vmul.f32 %v1234_v33, %v217_v30  ;;  %v224_v8 = vmul.f32 %v1234_v33, %v218_v59 }
  0xae   :  { %v1270_v55 = vpop.permute.xlu1 %270  ;;  %v236_v56 = vpop.permute.xlu0 %235  ;;  %v1398_v44 = vsub.s32 0, %v314_v37  ;;  %v1400_v23 = vsub.s32 1, %v314_v37 }
  0xaf   :  { %v225_v14 = vadd.f32 %v223_v57, %v194_v61 }
  0xb2   :  { %v234_v18 = vpop.permute.xlu1 %233  ;;  %v257_v21 = vpop.permute.xlu0 %256 }
  0xb3   :  { %v238_v7 = vsel %vm237_vm15, %v232_v48, %v234_v18  ;;  %v120_v48 = vadd.f32 %v118_v31, %v91_v16  ;;  %v239_v42 = vsel %vm237_vm15, %v234_v18, %v236_v56 }
  0xb4   :  { %v242_v19 = vsel %vm1650_vm8, %v238_v7, 0.0  ;;  %v243_v56 = vsel %vm1652_vm10, %v239_v42, 0.0  ;;  %vm1656_vm8 = vcmask 908288   ;;  %vm1653_vm10 = vmand %vm1324_vm11, %vm1287_vm12 }
  0xb5   :  { %v145_v47 = vadd.f32 %v143_v17, %v120_v48  ;;  %v248_v20 = vmul.f32 %v1237_v41, %v242_v19  ;;  %v249_v26 = vmul.f32 %v1237_v41, %v243_v56 }
  0xb6   :  { %v296_v34 = vpop.permute.xlu1 %295  ;;  %v261_v51 = vpop.permute.xlu0 %260 }
  0xb7   :  { %v170_v3 = vadd.f32 %v168_v53, %v145_v47  ;;  %v250_v27 = vadd.f32 %v248_v20, %v225_v14 }
  0xb9   :  { %v195_v25 = vadd.f32 %v193_v58, %v170_v3 }
  0xba   :  { %v259_v60 = vpop.permute.xlu1 %258  ;;  %v284_v22 = vpop.permute.xlu0 %283 }
  0xbb   :  { %v263_v63 = vsel %vm1651_vm9, %v257_v21, %v259_v60  ;;  %v264_v0 = vsel %vm1651_vm9, %v259_v60, %v261_v51  ;;  %vm1655_vm9 = vmand %vm1304_vm14, %vm1260_vm7  ;;  %v226_v35 = vadd.f32 %v224_v8, %v195_v25 }
  0xbc   :  { %v267_v28 = vsel %vm1304_vm14, %v263_v63, 0.0  ;;  %v268_v21 = vsel %vm1324_vm11, %v264_v0, 0.0 }
  0xbd   :  { %v273_v18 = vmul.f32 %v1270_v55, %v267_v28  ;;  %v274_v38 = vmul.f32 %v1270_v55, %v268_v21  ;;  %v251_v7 = vadd.f32 %v249_v26, %v226_v35 }
  0xbe   :  { %v282_v24 = vpop.permute.xlu1 %281  ;;  %v310_v58 = vpop.permute.xlu0 %309 }
  0xbf   :  { %v288_v31 = vsel %vm1656_vm8, %v282_v24, %v284_v22  ;;  %v275_v39 = vadd.f32 %v273_v18, %v250_v27  ;;  %v276_v30 = vadd.f32 %v274_v38, %v251_v7 }
  0xc0   :  { %v292_v33 = vsel %vm1655_vm9, %v288_v31, 0.0  ;;  %vm1674_vm9 = vmand %vm1247_vm4, %vm1251_vm5 }
  0xc1   :  { %v298_v40 = vmul.f32 %v296_v34, %v292_v33 }
  0xc2   :  { %v286_v41 = vpop.permute.xlu1 %285 }
  0xc3   :  { %v300_v16 = vadd.f32 %v298_v40, %v275_v39  ;;  %v289_v17 = vsel %vm1656_vm8, %v284_v22, %v286_v41  ;;  %v371_v41 = vpop.permute.xlu0 %370  ;;  %vm1675_vm8 = vcmask 7168  }
  0xc4   :  { %v293_v29 = vsel %vm1653_vm10, %v289_v17, 0.0  ;;  %vm1654_vm10 = vcmask 1043456  }
  0xc5   :  { %302 = vst [vmem:[#allocation2 + $0x8] sm:$0xff] %v300_v16  ;;  %v299_v55 = vmul.f32 %v296_v34, %v293_v29 }
  0xc6   :  { %v329_v51 = vpop.permute.xlu1 %328 }
  0xc7   :  { %v301_v36 = vadd.f32 %v299_v55, %v276_v30 }
  0xc9   :  { %303 = vst [vmem:[#allocation2 + $0x10] sm:$0xff] %v301_v36 }
  0xcb   :  { %v350_v33 = vpop.permute.xlu1 %349 }
  0xd0   :  { %v305_v48 = vld [vmem:[#allocation2 + $0x8] ss:$8 sm:$0x3]  ;;  %v326_v19 = vld [vmem:[#allocation2 + $0x9] ss:$8 sm:$0x3] }
  0xd1   :  { %v316_v53 = vrot.slane %v305_v48, %v1398_v44  ;;  %v320_v54 = vrot.slane %v305_v48, %v1400_v23  ;;  %v335_v57 = vrot.slane %v326_v19, %v1398_v44  ;;  %v339_v42 = vrot.slane %v326_v19, %v1400_v23  ;;  %v397_v34 = vld [vmem:[#allocation2 + $0xc] ss:$8 sm:$0x3]  ;;  %v412_v47 = vld [vmem:[#allocation2 + $0xd] ss:$8 sm:$0x3] }
  0xd2   :  { %v402_v32 = vrot.slane %v397_v34, %v1398_v44  ;;  %v406_v59 = vrot.slane %v397_v34, %v1400_v23  ;;  %v417_v60 = vrot.slane %v412_v47, %v1398_v44  ;;  %v421_v61 = vrot.slane %v412_v47, %v1400_v23  ;;  %v368_v28 = vld [vmem:[#allocation2 + $0xb] ss:$8 sm:$0x3]  ;;  %v347_v21 = vld [vmem:[#allocation2 + $0xa] ss:$8 sm:$0x3]  ;;  %v392_v47 = vpop.permute.xlu1 %391 }
  0xd3   :  { %v323_v20 = vmul.f32 %v316_v53, %v310_v58  ;;  %v324_v63 = vmul.f32 %v320_v54, %v310_v58  ;;  %v342_v0 = vmul.f32 %v335_v57, %v329_v51  ;;  %v343_v56 = vmul.f32 %v339_v42, %v329_v51  ;;  %v446_v22 = vld [vmem:[#allocation2 + $0xf] ss:$8 sm:$0x3]  ;;  %v429_v24 = vld [vmem:[#allocation2 + $0xe] ss:$8 sm:$0x3] }
  0xd4   :  { %v409_v3 = vmul.f32 %v402_v32, %v310_v58  ;;  %v410_v8 = vmul.f32 %v406_v59, %v310_v58  ;;  %v424_v14 = vmul.f32 %v417_v60, %v329_v51  ;;  %v425_v18 = vmul.f32 %v421_v61, %v329_v51 }
  0xd5   :  { %v344_v25 = vadd.f32 %v342_v0, %v323_v20  ;;  %v345_v26 = vadd.f32 %v343_v56, %v324_v63  ;;  %v377_v27 = vrot.slane %v368_v28, %v1398_v44  ;;  %v381_v31 = vrot.slane %v368_v28, %v1400_v23 }
  0xd6   :  { %v426_v35 = vadd.f32 %v424_v14, %v409_v3  ;;  %v427_v38 = vadd.f32 %v425_v18, %v410_v8  ;;  %v356_v39 = vrot.slane %v347_v21, %v1398_v44  ;;  %v360_v40 = vrot.slane %v347_v21, %v1400_v23 }
  0xd7   :  { %v451_v7 = vrot.slane %v446_v22, %v1398_v44  ;;  %v455_v16 = vrot.slane %v446_v22, %v1400_v23  ;;  %v434_v17 = vrot.slane %v429_v24, %v1398_v44  ;;  %v438_v29 = vrot.slane %v429_v24, %v1400_v23 }
  0xd8   :  { %v363_v30 = vmul.f32 %v356_v39, %v350_v33  ;;  %v364_v55 = vmul.f32 %v360_v40, %v350_v33  ;;  %v384_v48 = vmul.f32 %v377_v27, %v371_v41  ;;  %v385_v19 = vmul.f32 %v381_v31, %v371_v41 }
  0xd9   :  { %v441_v36 = vmul.f32 %v434_v17, %v350_v33  ;;  %v442_v37 = vmul.f32 %v438_v29, %v350_v33  ;;  %v458_v54 = vmul.f32 %v451_v7, %v371_v41  ;;  %v459_v57 = vmul.f32 %v455_v16, %v371_v41 }
  0xda   :  { %v365_v51 = vadd.f32 %v363_v30, %v344_v25  ;;  %v366_v53 = vadd.f32 %v364_v55, %v345_v26  ;;  %v508_v55 = vld [vmem:[%s1637_s6] sm:$0xf] }
  0xdb   :  { %v443_v42 = vadd.f32 %v441_v36, %v426_v35  ;;  %v444_v34 = vadd.f32 %v442_v37, %v427_v38  ;;  %v536_v36 = vld [vmem:[%s1638_s7] sm:$0xff] }
  0xdc   :  { %v386_v58 = vadd.f32 %v384_v48, %v365_v51  ;;  %v387_v32 = vadd.f32 %v385_v19, %v366_v53  ;;  %v544_v37 = vld [vmem:[%s1639_s8] sm:$0xff] }
  0xdd   :  { %v460_v59 = vadd.f32 %v458_v54, %v443_v42  ;;  %v461_v60 = vadd.f32 %v459_v57, %v444_v34 }
  0xde   :  { %v394_v61 = vadd.f32 %v392_v47, %v386_v58  ;;  %v395_v20 = vadd.f32 %v392_v47, %v387_v32 }
  0xdf   :  { %v462_v63 = vadd.f32 %v460_v59, %v392_v47  ;;  %v463_v0 = vadd.f32 %v461_v60, %v392_v47 }
  0xe0   :  { %v465_v56 = vsel %vm1654_vm10, %v394_v61, 0.0  ;;  %v466_v28 = vsel %vm1654_vm10, %v395_v20, 0.0 }
  0xe1   :  { %v467_v3 = vadd.f32 %v466_v28, %v465_v56  ;;  %v470_v8 = vsel %vm1654_vm10, %v462_v63, 0.0  ;;  %v471_v14 = vsel %vm1654_vm10, %v463_v0, 0.0 }
  0xe2   :  { %v472_v18 = vadd.f32 %v471_v14, %v470_v8 }
  0xe3   :  { %468 = vadd.xlane.f32.xlu1 %v467_v3 }
  0xe4   :  { %473 = vadd.xlane.f32.xlu0 %v472_v18 }
 0x16c   :  { %v469_v21 = vpop.xlane.xlu1 %468 }
 0x16d   :  { %v474_v22 = vpop.xlane.xlu0 %473 }
 0x16e   :  { %v475_v24 = vadd.f32 %v474_v22, %v469_v21  ;;  %v725_v22 = vld [vmem:[%s1640_s9] sm:$0xf] }
 0x170   :  { %v476_v25 = vmul.f32 0.001953125, %v475_v24  ;;  %v804_v24 = vld [vmem:[%s1641_s10] sm:$0xf] }
 0x172   :  { %v479_v26 = vsub.f32 %v462_v63, %v476_v25  ;;  %v480_v27 = vsub.f32 %v463_v0, %v476_v25  ;;  %v477_v31 = vsub.f32 %v394_v61, %v476_v25  ;;  %v478_v33 = vsub.f32 %v395_v20, %v476_v25 }
 0x174   :  { %v488_v35 = vmul.f32 %v479_v26, %v479_v26  ;;  %v489_v38 = vmul.f32 %v480_v27, %v480_v27  ;;  %v481_v39 = vmul.f32 %v477_v31, %v477_v31  ;;  %v482_v40 = vmul.f32 %v478_v33, %v478_v33 }
 0x176   :  { %v490_v41 = vsel %vm1654_vm10, %v488_v35, 0.0  ;;  %v491_v7 = vsel %vm1654_vm10, %v489_v38, 0.0  ;;  %v483_v16 = vsel %vm1654_vm10, %v481_v39, 0.0  ;;  %v484_v17 = vsel %vm1654_vm10, %v482_v40, 0.0 }
 0x177   :  { %v492_v29 = vadd.f32 %v491_v7, %v490_v41  ;;  %v485_v30 = vadd.f32 %v484_v17, %v483_v16  ;;  %vm1673_vm10 = vcmask 121856  }
 0x179   :  { %493 = vadd.xlane.f32.xlu1 %v492_v29  ;;  %486 = vadd.xlane.f32.xlu0 %v485_v30 }
 0x18a   :  { %511 = vperm.xlu1 %1005, %v508_v55  }
 0x18e   :  { %1007 = vset.pattern.permute.xlu1 %v1049_v2 }
 0x18f   :  { %539 = vperm.xlu1 %1007, %v536_v36  }
 0x193   :  { %1008 = vset.pattern.permute.xlu1 %v1048_v1 }
 0x194   :  { %547 = vperm.xlu1 %1008, %v544_v37  }
 0x198   :  { %569 = vperm.xlu1 %1008, %v536_v36  }
 0x19c   :  { %1009 = vset.pattern.permute.xlu1 %v1050_v4 }
 0x19d   :  { %589 = vperm.xlu1 %1009, %v536_v36  }
 0x1a1   :  { %556 = vrot.lane.b32.xlu1 %v1053_v6, %s1051_s29 }
 0x1a2   :  { %1011 = vset.pattern.permute.xlu1 %v1054_v9 }
 0x1a5   :  { %576 = vrot.lane.b32.xlu1 %v1053_v6, %s1055_s16 }
 0x1a9   :  { %629 = vperm.xlu1 %1011, %v536_v36  }
 0x1ad   :  { %1012 = vset.pattern.permute.xlu1 %v1058_v10  ;;  %v497_v10 = vld [vmem:[%s1636_s5] sm:$0xf] }
 0x1ae   :  { %655 = vperm.xlu1 %1012, %v536_v36  }
 0x1b2   :  { %1013 = vset.pattern.permute.xlu1 %v1060_v11 }
 0x1b3   :  { %675 = vperm.xlu1 %1013, %v536_v36  }
 0x1b7   :  { %1014 = vset.pattern.permute.xlu1 %v1062_v12 }
 0x1b8   :  { %695 = vperm.xlu1 %1014, %v536_v36  }
 0x1bc   :  { %1015 = vset.pattern.permute.xlu1 %v1064_v13 }
 0x1bd   :  { %715 = vperm.xlu1 %1015, %v536_v36  }
 0x1c1   :  { %1017 = vset.pattern.permute.xlu1 %v1050_v4 }
 0x202   :  { %v494_v2 = vpop.xlane.xlu1 %493  ;;  %v487_v48 = vpop.xlane.xlu0 %486 }
 0x203   :  { %v495_v19 = vadd.f32 %v494_v2, %v487_v48 }
 0x205   :  { %v496_v51 = vmul.f32 0.001953125, %v495_v19 }
 0x206   :  { %v512_v34 = vpop.permute.xlu1 %511 }
 0x207   :  { %v498_v53 = vadd.f32 1e-05, %v496_v51 }
 0x209   :  { %1022 = vrsqrt.f32 %v498_v53 }
 0x20a   :  { %v540_v28 = vpop.permute.xlu1 %539 }
 0x20f   :  { %v1463_v14 = vpop.permute.xlu1 %547 }
 0x213   :  { %v570_v25 = vpop.permute.xlu1 %569 }
 0x216   :  { %v1023_v11 = vpop.eup %1022 }
 0x217   :  { %v500_v54 = vmul.f32 %v1023_v11, %v497_v10 }
 0x219   :  { %503 = vperm.xlu0 %1006, %v500_v54  }
 0x21d   :  { %1010 = vset.pattern.permute.xlu0 %v1052_v5 }
 0x21e   :  { %609 = vperm.xlu0 %1010, %v536_v36  }
 0x222   :  { %596 = vrot.lane.b32.xlu0 %v1053_v6, %s1056_s2 }
 0x223   :  { %1016 = vset.pattern.permute.xlu0 %v1048_v1 }
 0x226   :  { %616 = vrot.lane.b32.xlu0 %v1053_v6, %s1057_s17 }
 0x22a   :  { %646 = vrot.lane.b32.xlu0 %v1053_v6, %s1059_s18 }
 0x22e   :  { %666 = vrot.lane.b32.xlu0 %v1053_v6, %s1061_s19 }
 0x232   :  { %686 = vrot.lane.b32.xlu0 %v1053_v6, %s1063_s20 }
 0x294   :  { %v504_v4 = vpop.permute.xlu0 %503 }
 0x295   :  { %v506_v12 = vmul.f32 %v504_v4, %v477_v31  ;;  %v507_v13 = vmul.f32 %v504_v4, %v478_v33  ;;  %v516_v57 = vmul.f32 %v504_v4, %v479_v26  ;;  %v517_v42 = vmul.f32 %v504_v4, %v480_v27  ;;  %v590_v26 = vpop.permute.xlu1 %589 }
 0x297   :  { %v514_v47 = vadd.f32 %v512_v34, %v506_v12  ;;  %v515_v58 = vadd.f32 %v512_v34, %v507_v13  ;;  %v518_v32 = vadd.f32 %v516_v57, %v512_v34  ;;  %v519_v59 = vadd.f32 %v517_v42, %v512_v34 }
 0x299   :  { %v520_v60 = vmax.f32 %v514_v47, 0.0  ;;  %v521_v61 = vmax.f32 %v515_v58, 0.0  ;;  %v522_v20 = vmax.f32 %v518_v32, 0.0  ;;  %v523_v63 = vmax.f32 %v519_v59, 0.0  ;;  %v610_v27 = vpop.permute.xlu0 %609 }
 0x29b   :  { %524 = vst [vmem:[#allocation2 + $0x8] sm:$0xf] %v520_v60  ;;  %525 = vst [vmem:[#allocation2 + $0x10] sm:$0xf] %v521_v61  ;;  %v528_v0 = vrot.slane %v522_v20, 4  ;;  %v529_v56 = vrot.slane %v523_v63, 4 }
 0x29d   :  { %532 = vst [vmem:[#allocation2 + $0x8] sm:$0xf0] %v528_v0  ;;  %533 = vst [vmem:[#allocation2 + $0x10] sm:$0xf0] %v529_v56 }
 0x2a4   :  { %v534_v3 = vld [vmem:[#allocation2 + $0x8] sm:$0xff]  ;;  %v535_v8 = vld [vmem:[#allocation2 + $0x10] sm:$0xff] }
 0x2a5   :  { %v543_v18 = vmul.f32 %v540_v28, %v535_v8  ;;  %580 = vrot.lane.b32.xlu0 %v535_v8, %s1055_s16  ;;  %558 = vrot.lane.b32.xlu1 %v534_v3, %s1051_s29  ;;  %v542_v53 = vmul.f32 %v540_v28, %v534_v3 }
 0x2a7   :  { %v1468_v21 = vadd.f32 %v1463_v14, %v543_v18  ;;  %v550_v34 = vadd.f32 %v1463_v14, %v542_v53 }
 0x2a9   :  { %600 = vrot.lane.b32.xlu0 %v535_v8, %s1056_s2  ;;  %560 = vrot.lane.b32.xlu1 %v535_v8, %s1051_s29 }
 0x2ad   :  { %620 = vrot.lane.b32.xlu0 %v535_v8, %s1057_s17  ;;  %578 = vrot.lane.b32.xlu1 %v534_v3, %s1055_s16 }
 0x2b1   :  { %642 = vrot.lane.b32.xlu0 %v534_v3, %s1059_s18  ;;  %598 = vrot.lane.b32.xlu1 %v534_v3, %s1056_s2 }
 0x2b5   :  { %662 = vrot.lane.b32.xlu0 %v534_v3, %s1061_s19  ;;  %618 = vrot.lane.b32.xlu1 %v534_v3, %s1057_s17 }
 0x2b9   :  { %682 = vrot.lane.b32.xlu0 %v534_v3, %s1063_s20  ;;  %644 = vrot.lane.b32.xlu1 %v535_v8, %s1059_s18 }
 0x2bd   :  { %704 = vrot.lane.b32.xlu0 %v535_v8, %s1065_s21  ;;  %664 = vrot.lane.b32.xlu1 %v535_v8, %s1061_s19 }
 0x2c1   :  { %684 = vrot.lane.b32.xlu1 %v535_v8, %s1063_s20  ;;  %728 = vperm.xlu0 %1016, %v725_v22  }
 0x2c5   :  { %702 = vrot.lane.b32.xlu1 %v534_v3, %s1065_s21  ;;  %1019 = vset.pattern.permute.xlu0 %v1054_v9  ;;  %v557_v9 = vpop.permute.xlu1 %556 }
 0x2c6   :  { %786 = vperm.xlu0 %1019, %v725_v22  }
 0x2c9   :  { %706 = vrot.lane.b32.xlu1 %v1053_v6, %s1065_s21  ;;  %v577_v31 = vpop.permute.xlu1 %576  ;;  %v597_v6 = vpop.permute.xlu0 %596  ;;  %s1066_s21 = smov [#allocation3]  }
 0x2ca   :  { %1021 = vset.pattern.permute.xlu0 %v1048_v1  ;;  %s965_s22 = sshll.u32 %s1066_s21, 4  ;;  %s966_s22 = int_to_ptr.vmem [resolvable:$true] %s965_s22 }
 0x2cb   :  { %p1031_p1 = scmp.lt.s32.totalorder %s966_s22, %s966_s22 }
 0x2cd   :  { %746 = vperm.xlu1 %1017, %v725_v22   ;;  %v630_v33 = vpop.permute.xlu1 %629  ;;  %v617_v38 = vpop.permute.xlu0 %616 }
 0x2d1   :  { %1018 = vset.pattern.permute.xlu1 %v1052_v5  ;;  %v1496_v35 = vpop.permute.xlu1 %655  ;;  %v647_v5 = vpop.permute.xlu0 %646 }
 0x2d2   :  { %766 = vperm.xlu1 %1018, %v725_v22  }
 0x2d5   :  { %v1498_v39 = vpop.permute.xlu1 %675  ;;  %v667_v41 = vpop.permute.xlu0 %666 }
 0x2d6   :  { %1020 = vset.pattern.permute.xlu1 %v1048_v1 }
 0x2d7   :  { %807 = vperm.xlu1 %1020, %v804_v24  }
 0x2d9   :  { %v1500_v40 = vpop.permute.xlu1 %695  ;;  %v687_v1 = vpop.permute.xlu0 %686 }
 0x2dd   :  { %v1502_v7 = vpop.permute.xlu1 %715 }
 0x317   :  { %v559_v16 = vpop.permute.xlu1 %558  ;;  %v581_v17 = vpop.permute.xlu0 %580 }
 0x318   :  { %v562_v37 = vsel %vm106_vm2, %v557_v9, %v559_v16 }
 0x319   :  { %v566_v51 = vsel %vm62_vm6, %v562_v37, 0.0  ;;  %vm1678_vm6 = vmmov %vm1675_vm8 }
 0x31a   :  { %v572_v12 = vmul.f32 %v570_v25, %v566_v51 }
 0x31b   :  { %v561_v29 = vpop.permute.xlu1 %560  ;;  %v601_v30 = vpop.permute.xlu0 %600 }
 0x31c   :  { %v563_v10 = vsel %vm106_vm2, %v559_v16, %v561_v29  ;;  %vm1676_vm2 = vmand %vm1239_vm0, %vm1260_vm7  ;;  %v574_v63 = vadd.f32 %v572_v12, %v550_v34 }
 0x31d   :  { %v567_v57 = vsel %vm1674_vm9, %v563_v10, 0.0 }
 0x31e   :  { %v573_v0 = vmul.f32 %v570_v25, %v567_v57 }
 0x31f   :  { %v579_v55 = vpop.permute.xlu1 %578  ;;  %v621_v36 = vpop.permute.xlu0 %620 }
 0x320   :  { %v582_v48 = vsel %vm131_vm3, %v577_v31, %v579_v55  ;;  %v583_v13 = vsel %vm131_vm3, %v579_v55, %v581_v17  ;;  %vm1677_vm3 = vmmov %vm1673_vm10 }
 0x321   :  { %v586_v54 = vsel %vm1239_vm0, %v582_v48, 0.0  ;;  %v587_v60 = vsel %vm1247_vm4, %v583_v13, 0.0  ;;  %vm1679_vm0 = vmand %vm1247_vm4, %vm1287_vm12 }
 0x322   :  { %v592_v47 = vmul.f32 %v590_v26, %v586_v54  ;;  %v593_v3 = vmul.f32 %v590_v26, %v587_v60  ;;  %v575_v26 = vadd.f32 %v573_v0, %v1468_v21  ;;  %vm1680_vm4 = vmand %vm1304_vm14, %vm1243_vm1 }
 0x323   :  { %v599_v2 = vpop.permute.xlu1 %598  ;;  %v643_v19 = vpop.permute.xlu0 %642 }
 0x324   :  { %v602_v4 = vsel %vm1673_vm10, %v597_v6, %v599_v2  ;;  %v603_v61 = vsel %vm1677_vm3, %v599_v2, %v601_v30  ;;  %v594_v8 = vadd.f32 %v592_v47, %v574_v63  ;;  %v595_v30 = vadd.f32 %v593_v3, %v575_v26  ;;  %vm1685_vm10 = vmand %vm1304_vm14, %vm1260_vm7 }
 0x325   :  { %v606_v58 = vsel %vm1676_vm2, %v602_v4, 0.0  ;;  %v607_v14 = vsel %vm1679_vm0, %v603_v61, 0.0 }
 0x326   :  { %v612_v28 = vmul.f32 %v610_v27, %v606_v58 }
 0x327   :  { %v619_v11 = vpop.permute.xlu1 %618  ;;  %v663_v32 = vpop.permute.xlu0 %662 }
 0x328   :  { %v622_v42 = vsel %vm1675_vm8, %v617_v38, %v619_v11  ;;  %v623_v56 = vsel %vm1678_vm6, %v619_v11, %v621_v36  ;;  %v613_v38 = vmul.f32 %v610_v27, %v607_v14  ;;  %v614_v16 = vadd.f32 %v612_v28, %v594_v8 }
 0x329   :  { %v626_v45 = vsel %vm1243_vm1, %v622_v42, 0.0  ;;  %v627_v24 = vsel %vm1251_vm5, %v623_v56, 0.0  ;;  %vm1681_vm8 = vcmask 916480   ;;  %vm1683_vm1 = vmand %vm1324_vm11, %vm1251_vm5  ;;  %vm1684_vm5 = vcmask 908288  }
 0x32a   :  { %v632_v25 = vmul.f32 %v630_v33, %v626_v45  ;;  %v633_v55 = vmul.f32 %v630_v33, %v627_v24  ;;  %vm1682_vm9 = vmmov %vm1681_vm8 }
 0x32b   :  { %v645_v59 = vpop.permute.xlu1 %644  ;;  %v683_v6 = vpop.permute.xlu0 %682 }
 0x32c   :  { %v648_v20 = vsel %vm212_vm13, %v643_v19, %v645_v59  ;;  %v649_v9 = vsel %vm212_vm13, %v645_v59, %v647_v5  ;;  %v634_v21 = vadd.f32 %v632_v25, %v614_v16  ;;  %vm1686_vm13 = vmmov %vm1684_vm5 }
 0x32d   :  { %v652_v18 = vsel %vm1260_vm7, %v648_v20, 0.0  ;;  %v653_v5 = vsel %vm1287_vm12, %v649_v9, 0.0  ;;  %vm1688_vm7 = vcmask 1043456  }
 0x32e   :  { %v658_v17 = vmul.f32 %v1496_v35, %v652_v18  ;;  %v659_v48 = vmul.f32 %v1496_v35, %v653_v5  ;;  %vm1692_vm2 = vmmov %vm1688_vm7 }
 0x32f   :  { %v665_v22 = vpop.permute.xlu1 %664  ;;  %v705_v53 = vpop.permute.xlu0 %704  ;;  %vm1693_vm3 = vmmov %vm1692_vm2 }
 0x330   :  { %v668_v31 = vsel %vm237_vm15, %v663_v32, %v665_v22  ;;  %v669_v29 = vsel %vm237_vm15, %v665_v22, %v667_v41  ;;  %v615_v41 = vadd.f32 %v613_v38, %v595_v30  ;;  %v660_v19 = vadd.f32 %v658_v17, %v634_v21  ;;  %vm1687_vm15 = vmand %vm1324_vm11, %vm1287_vm12 }
 0x331   :  { %v672_v49 = vsel %vm1680_vm4, %v668_v31, 0.0  ;;  %v673_v27 = vsel %vm1683_vm1, %v669_v29, 0.0  ;;  %vm1690_vm12 = vmmov %vm1688_vm7 }
 0x332   :  { %v678_v37 = vmul.f32 %v1498_v39, %v672_v49  ;;  %v635_v11 = vadd.f32 %v633_v55, %v615_v41  ;;  %v679_v54 = vmul.f32 %v1498_v39, %v673_v27  ;;  %vm1694_vm6 = vmmov %vm1692_vm2 }
 0x333   :  { %v685_v36 = vpop.permute.xlu1 %684  ;;  %vm1695_vm0 = vmmov %vm1692_vm2 }
 0x334   :  { %v688_v2 = vsel %vm1681_vm8, %v683_v6, %v685_v36  ;;  %v689_v46 = vsel %vm1682_vm9, %v685_v36, %v687_v1  ;;  %v680_v50 = vadd.f32 %v678_v37, %v660_v19  ;;  %v661_v12 = vadd.f32 %v659_v48, %v635_v11 }
 0x335   :  { %v692_v33 = vsel %vm1304_vm14, %v688_v2, 0.0  ;;  %v693_v10 = vsel %vm1324_vm11, %v689_v46, 0.0  ;;  %vm1689_vm11 = vmmov %vm1688_vm7 }
 0x336   :  { %v698_v51 = vmul.f32 %v1500_v40, %v692_v33  ;;  %v699_v13 = vmul.f32 %v1500_v40, %v693_v10  ;;  %v681_v47 = vadd.f32 %v679_v54, %v661_v12  ;;  %vm1691_vm14 = vmmov %vm1688_vm7 }
 0x337   :  { %v703_v1 = vpop.permute.xlu1 %702 }
 0x338   :  { %v708_v4 = vsel %vm1684_vm5, %v703_v1, %v705_v53  ;;  %v700_v57 = vadd.f32 %v698_v51, %v680_v50  ;;  %v701_v52 = vadd.f32 %v699_v13, %v681_v47 }
 0x339   :  { %v712_v35 = vsel %vm1685_vm10, %v708_v4, 0.0 }
 0x33a   :  { %v718_v42 = vmul.f32 %v1502_v7, %v712_v35 }
 0x33b   :  { %v707_v34 = vpop.permute.xlu1 %706 }
 0x33c   :  { %v720_v58 = vadd.f32 %v718_v42, %v700_v57  ;;  %v709_v39 = vsel %vm1686_vm13, %v705_v53, %v707_v34  ;;  %v729_v45 = vpop.permute.xlu0 %728 }
 0x33d   :  { %v713_v15 = vsel %vm1687_vm15, %v709_v39, 0.0 }
 0x33e   :  { %722 = vst [vmem:[#allocation2 + $0x8] sm:$0xff] %v720_v58  ;;  %v719_v32 = vmul.f32 %v1502_v7, %v713_v15 }
 0x340   :  { %v721_v59 = vadd.f32 %v719_v32, %v701_v52 }
 0x341   :  { %v787_v46 = vpop.permute.xlu0 %786 }
 0x342   :  { %723 = vst [vmem:[#allocation2 + $0x10] sm:$0xff] %v721_v59 }
 0x348   :  { %v747_v0 = vpop.permute.xlu1 %746 }
 0x349   :  { %v724_v40 = vld [vmem:[#allocation2 + $0x8] ss:$8 sm:$0x3]  ;;  %v812_v60 = vld [vmem:[#allocation2 + $0xc] ss:$8 sm:$0x3] }
 0x34a   :  { %v735_v61 = vrot.slane %v724_v40, %v1398_v44  ;;  %v739_v20 = vrot.slane %v724_v40, %v1400_v23  ;;  %v817_v63 = vrot.slane %v812_v60, %v1398_v44  ;;  %v821_v43 = vrot.slane %v812_v60, %v1400_v23  ;;  %v744_v62 = vld [vmem:[#allocation2 + $0x9] ss:$8 sm:$0x3]  ;;  %v826_v56 = vld [vmem:[#allocation2 + $0xd] ss:$8 sm:$0x3] }
 0x34b   :  { %v753_v28 = vrot.slane %v744_v62, %v1398_v44  ;;  %v757_v7 = vrot.slane %v744_v62, %v1400_v23  ;;  %v831_v3 = vrot.slane %v826_v56, %v1398_v44  ;;  %v835_v8 = vrot.slane %v826_v56, %v1400_v23  ;;  %v784_v25 = vld [vmem:[#allocation2 + $0xb] ss:$8 sm:$0x3]  ;;  %v858_v9 = vld [vmem:[#allocation2 + $0xf] ss:$8 sm:$0x3] }
 0x34c   :  { %v742_v14 = vmul.f32 %v735_v61, %v729_v45  ;;  %v743_v18 = vmul.f32 %v739_v20, %v729_v45  ;;  %v824_v22 = vmul.f32 %v817_v63, %v729_v45  ;;  %v825_v24 = vmul.f32 %v821_v43, %v729_v45  ;;  %v764_v38 = vld [vmem:[#allocation2 + $0xa] ss:$8 sm:$0x3]  ;;  %v842_v16 = vld [vmem:[#allocation2 + $0xe] ss:$8 sm:$0x3] }
 0x34d   :  { %v760_v31 = vmul.f32 %v753_v28, %v747_v0  ;;  %v761_v26 = vmul.f32 %v757_v7, %v747_v0  ;;  %v838_v6 = vmul.f32 %v831_v3, %v747_v0  ;;  %v839_v49 = vmul.f32 %v835_v8, %v747_v0  ;;  %v767_v2 = vpop.permute.xlu1 %766 }
 0x34e   :  { %v793_v17 = vrot.slane %v784_v25, %v1398_v44  ;;  %v797_v29 = vrot.slane %v784_v25, %v1400_v23  ;;  %v863_v30 = vrot.slane %v858_v9, %v1398_v44  ;;  %v867_v55 = vrot.slane %v858_v9, %v1400_v23 }
 0x34f   :  { %v762_v5 = vadd.f32 %v760_v31, %v742_v14  ;;  %v763_v36 = vadd.f32 %v761_v26, %v743_v18  ;;  %v840_v21 = vadd.f32 %v838_v6, %v824_v22  ;;  %v841_v37 = vadd.f32 %v839_v49, %v825_v24  ;;  %v919_v26 = vld [vmem:[%s1643_s12] sm:$0xf] }
 0x350   :  { %v773_v27 = vrot.slane %v764_v38, %v1398_v44  ;;  %v777_v33 = vrot.slane %v764_v38, %v1400_v23  ;;  %v847_v41 = vrot.slane %v842_v16, %v1398_v44  ;;  %v851_v48 = vrot.slane %v842_v16, %v1400_v23 }
 0x351   :  { %v800_v1 = vmul.f32 %v793_v17, %v787_v46  ;;  %v801_v11 = vmul.f32 %v797_v29, %v787_v46  ;;  %v870_v54 = vmul.f32 %v863_v30, %v787_v46  ;;  %v871_v50 = vmul.f32 %v867_v55, %v787_v46  ;;  %v908_v29 = vld [vmem:[%s1642_s11] sm:$0xf] }
 0x352   :  { %v780_v19 = vmul.f32 %v773_v27, %v767_v2  ;;  %v781_v51 = vmul.f32 %v777_v33, %v767_v2  ;;  %v854_v53 = vmul.f32 %v847_v41, %v767_v2  ;;  %v855_v10 = vmul.f32 %v851_v48, %v767_v2  ;;  %v808_v57 = vpop.permute.xlu1 %807 }
 0x354   :  { %v782_v4 = vadd.f32 %v780_v19, %v762_v5  ;;  %v783_v35 = vadd.f32 %v781_v51, %v763_v36  ;;  %v856_v12 = vadd.f32 %v854_v53, %v840_v21  ;;  %v857_v13 = vadd.f32 %v855_v10, %v841_v37  ;;  %v939_v5 = vld [vmem:[%s1631_s0] sm:$0xf0]  ;;  %v940_v36 = vld [vmem:[%s1631_s0 + $0x8] sm:$0xf0]  ;;  %v931_v19 = vld [vmem:[%s1631_s0] sm:$0xf] }
 0x355   :  { %v943_v21 = vrot.slane %v939_v5, 4  ;;  %v944_v37 = vrot.slane %v940_v36, 4  ;;  %v932_v51 = vld [vmem:[%s1631_s0 + $0x8] sm:$0xf]  ;;  %s1026_s0 = scalar_lea.vmem %s966_s22, 256 }
 0x356   :  { %v872_v42 = vadd.f32 %v870_v54, %v856_v12  ;;  %v873_v34 = vadd.f32 %v871_v50, %v857_v13  ;;  %v802_v47 = vadd.f32 %v800_v1, %v782_v4  ;;  %v803_v58 = vadd.f32 %v801_v11, %v783_v35  ;;  %p1027_p0 = scmp.ne.s32.totalorder %s966_s22, %s1026_s0  ;;  %p1032_p2 = scmp.lt.s32.totalorder %s1026_s0, %s1026_s0 }
 0x358   :  { %v874_v44 = vadd.f32 %v872_v42, %v808_v57  ;;  %v875_v39 = vadd.f32 %v873_v34, %v808_v57  ;;  %v810_v23 = vadd.f32 %v808_v57, %v802_v47  ;;  %v811_v15 = vadd.f32 %v808_v57, %v803_v58  ;;  %p1033_p3 = por %p1032_p2, %p1031_p1 }
 0x35a   :  { %v881_v52 = vsel %vm1688_vm7, %v874_v44, 0.0  ;;  %v882_v32 = vsel %vm1689_vm11, %v875_v39, 0.0  ;;  %v876_v59 = vsel %vm1690_vm12, %v810_v23, 0.0  ;;  %v877_v40 = vsel %vm1691_vm14, %v811_v15, 0.0  ;;  %p1034_p4 = pnand %p1033_p3, %p1027_p0 }
 0x35b   :  { %v883_v60 = vadd.f32 %v882_v32, %v881_v52  ;;  %v878_v61 = vadd.f32 %v877_v40, %v876_v59 }
 0x35d   :  { %884 = vadd.xlane.f32.xlu0 %v883_v60  ;;  %879 = vadd.xlane.f32.xlu1 %v878_v61 }
 0x3e6   :  { %v885_v20 = vpop.xlane.xlu0 %884  ;;  %v880_v63 = vpop.xlane.xlu1 %879 }
 0x3e7   :  { %v886_v43 = vadd.f32 %v885_v20, %v880_v63 }
 0x3e9   :  { %v887_v0 = vmul.f32 0.001953125, %v886_v43 }
 0x3eb   :  { %v890_v62 = vsub.f32 %v874_v44, %v887_v0  ;;  %v891_v56 = vsub.f32 %v875_v39, %v887_v0  ;;  %v888_v45 = vsub.f32 %v810_v23, %v887_v0  ;;  %v889_v28 = vsub.f32 %v811_v15, %v887_v0 }
 0x3ed   :  { %v899_v7 = vmul.f32 %v890_v62, %v890_v62  ;;  %v900_v3 = vmul.f32 %v891_v56, %v891_v56  ;;  %v892_v8 = vmul.f32 %v888_v45, %v888_v45  ;;  %v893_v14 = vmul.f32 %v889_v28, %v889_v28 }
 0x3ef   :  { %v901_v18 = vsel %vm1692_vm2, %v899_v7, 0.0  ;;  %v902_v22 = vsel %vm1693_vm3, %v900_v3, 0.0  ;;  %v894_v24 = vsel %vm1694_vm6, %v892_v8, 0.0  ;;  %v895_v25 = vsel %vm1695_vm0, %v893_v14, 0.0 }
 0x3f0   :  { %v903_v9 = vadd.f32 %v902_v22, %v901_v18  ;;  %v896_v31 = vadd.f32 %v895_v25, %v894_v24 }
 0x3f2   :  { %904 = vadd.xlane.f32.xlu1 %v903_v9  ;;  %897 = vadd.xlane.f32.xlu0 %v896_v31 }
 0x403   :  { %922 = vperm.xlu1 %1020, %v919_v26  }
 0x47b   :  { %v905_v6 = vpop.xlane.xlu1 %904  ;;  %v898_v49 = vpop.xlane.xlu0 %897 }
 0x47c   :  { %v906_v38 = vadd.f32 %v905_v6, %v898_v49 }
 0x47e   :  { %v907_v16 = vmul.f32 0.001953125, %v906_v38 }
 0x47f   :  { %v923_v48 = vpop.permute.xlu1 %922 }
 0x480   :  { %v909_v17 = vadd.f32 1e-05, %v907_v16 }
 0x482   :  { %1024 = vrsqrt.f32 %v909_v17 }
 0x48f   :  { %v1025_v30 = vpop.eup %1024 }
 0x490   :  { %v911_v55 = vmul.f32 %v1025_v30, %v908_v29 }
 0x492   :  { %914 = vperm.xlu0 %1021, %v911_v55  }
 0x50d   :  { %v915_v2 = vpop.permute.xlu0 %914 }
 0x50e   :  { %v917_v46 = vmul.f32 %v915_v2, %v888_v45  ;;  %v918_v27 = vmul.f32 %v915_v2, %v889_v28  ;;  %v927_v33 = vmul.f32 %v915_v2, %v890_v62  ;;  %v928_v41 = vmul.f32 %v915_v2, %v891_v56 }
 0x510   :  { %v925_v53 = vadd.f32 %v923_v48, %v917_v46  ;;  %v926_v10 = vadd.f32 %v923_v48, %v918_v27  ;;  %v929_v1 = vadd.f32 %v927_v33, %v923_v48  ;;  %v930_v11 = vadd.f32 %v928_v41, %v923_v48 }
 0x512   :  { %v933_v54 = vadd.f32 %v931_v19, %v925_v53  ;;  %v934_v50 = vadd.f32 %v932_v51, %v926_v10  ;;  %v947_v4 = vadd.f32 %v943_v21, %v929_v1  ;;  %v948_v35 = vadd.f32 %v944_v37, %v930_v11 }
 0x514   :  { %v935_v12 = vmax.f32 %v933_v54, 0.0  ;;  %v936_v13 = vmax.f32 %v934_v50, 0.0  ;;  %v949_v57 = vmax.f32 %v947_v4, 0.0  ;;  %v950_v42 = vmax.f32 %v948_v35, 0.0 }
 0x516   :  { %v953_v34 = vrot.slane %v949_v57, 4  ;;  %v954_v47 = vrot.slane %v950_v42, 4  ;;  %937 = vst [vmem:[#allocation3] sm:$0xf] %v935_v12  ;;  %938 = vst [vmem:[#allocation3 + $0x8] sm:$0xf] %v936_v13 }
 0x518   :  { %957 = vst [vmem:[#allocation3] sm:$0xf0] %v953_v34  ;;  %958 = vst [vmem:[#allocation3 + $0x8] sm:$0xf0] %v954_v47 }
 0x519   :  { %1037 = shalt.err (!%p1034_p4)
}
 0x51a   :  { %968 = dma.vmem_to_hbm [thread:$0]  %s966_s22, 256, %s1644_s13, [#allocation4]  }
 0x51b   :  { %1046 = dma.done.wait [#allocation4], 256  }
 0x51c   :  { %1047 = vsyncadd [#allocation4], 4294967040 }
 0x51d   :  { %972 = vsyncpa [#allocation4], 1 }

</bundles_post_ra>
